<compile_context>
chip_gen: v6e
topology: v6e:2x2x1
jax: 0.10.0
libtpu: 0.0.40
codegen_flags: <defaults>
</compile_context>

<pallas_src>
import jax
import jax.numpy as jnp
from jax import lax
from jax.experimental import pallas as pl
from jax.experimental.pallas import tpu as pltpu

# ----- model hyper-parameters (bert-base-multilingual-cased -> D=768, 12 layers) -----
NUM_LAYERS = 12      # config.num_hidden_layers
BATCH      = 2
SEQ        = 16      # number of subword tokens
EMB_DIM    = 768     # word_embedding_size ('base' model)
OUT_DIM    = 512     # output_size
NUM_WORDS  = 8       # scatter_mean target size (max(subword_indices)+1)


def word_encoder_kernel(coef_rep_ref, idx_ref, h_ref, w_ref, b_ref, out_ref):
    """One grid step == one batch row.

    coef_rep_ref : VMEM (1, L*S)   f32   gamma*softmax(w) repeated S times per layer
    idx_ref      : VMEM (1, 1, L*S) i32  subword->word indices, tiled L times
    h_ref        : VMEM (L, 1, S, D) f32 BERT hidden states for this batch row
    w_ref        : VMEM (D, OUT)   f32   projection weight
    b_ref        : VMEM (1, OUT)   f32   projection bias
    out_ref      : VMEM (1, NW, OUT) f32 word-level encodings
    """
    L, _, S, D = h_ref.shape
    LS = coef_rep_ref.shape[-1]          # L * S
    NW = out_ref.shape[1]

    # ---- (1)+(3a) fused: layer mix + scatter-sum as ONE MXU matmul ----------
    idx = idx_ref[0]                                              # (1, LS) int32
    hits = lax.broadcasted_iota(jnp.int32, (NW, LS), 0) == idx    # (NW, LS) bool
    # coefficient-scaled scatter matrix (bf16 only as an MXU operand)
    scatter_mat = jnp.where(hits, coef_rep_ref[...], 0.0).astype(jnp.bfloat16)
    # (L,1,S,D) -> (L*S, D): layout-free collapse (S multiple of sublane tile)
    h_flat = h_ref[...].reshape(LS, D).astype(jnp.bfloat16)
    word_sums = jnp.dot(scatter_mat, h_flat,
                        preferred_element_type=jnp.float32)       # (NW, D) f32

    # ---- scatter_mean normalization (counts are exact; exact divide) --------
    counts = jnp.sum(hits.astype(jnp.float32), axis=1, keepdims=True) / L  # (NW,1)
    means = word_sums / jnp.maximum(counts, 1.0)                  # (NW, D) f32

    # ---- (2) dropout (eval -> identity), Linear, identity activation --------
    # TODO(synk): training-mode dropout (pltpu PRNG) not implemented.
    proj = jnp.dot(means.astype(jnp.bfloat16), w_ref[...].astype(jnp.bfloat16),
                   preferred_element_type=jnp.float32)            # (NW, OUT) f32
    nonempty = (counts > 0.0).astype(jnp.float32)                 # (NW, 1)
    out_ref[0] = (proj + b_ref[...]) * nonempty                   # empty buckets -> 0


def word_encoder_forward(hidden_states, subword_indices, coef, proj_w, proj_b):
    """hidden_states: (L, B, S, D) f32; subword_indices: (B, S) int32; coef: (L,) f32."""
    L, B, S, D = hidden_states.shape
    OUT = proj_w.shape[1]
    NW = NUM_WORDS
    LS = L * S

    # Tiny parameter/index-space prep (O(L*S) elements, not a pass over activations).
    coef_rep = jnp.repeat(coef.astype(jnp.float32), S)[None, :]          # (1, L*S)
    idx_tiled = jnp.tile(subword_indices[:, None, :], (1, 1, L))         # (B, 1, L*S)

    return pl.pallas_call(
        word_encoder_kernel,
        out_shape=jax.ShapeDtypeStruct((B, NW, OUT), jnp.float32),
        grid=(B,),
        in_specs=[
            pl.BlockSpec((1, LS), lambda b: (0, 0)),              # coef_rep (shared)
            pl.BlockSpec((1, 1, LS), lambda b: (b, 0, 0)),        # tiled indices
            pl.BlockSpec((L, 1, S, D), lambda b: (0, b, 0, 0)),   # hidden states (f32)
            pl.BlockSpec((D, OUT), lambda b: (0, 0)),             # projection weight
            pl.BlockSpec((1, OUT), lambda b: (0, 0)),             # projection bias
        ],
        out_specs=pl.BlockSpec((1, NW, OUT), lambda b: (b, 0, 0)),
        compiler_params=pltpu.CompilerParams(
            dimension_semantics=("parallel",),        # batch rows -> both v7x TCs
            vmem_limit_bytes=32 * 1024 * 1024,
        ),
    )(coef_rep, idx_tiled, hidden_states, proj_w, proj_b)


def reference_forward(hidden_states, subword_indices, coef, proj_w, proj_b):
    """Pure-JAX f32 reference with the module's original op order
    (mix -> dropout(identity) -> Linear -> identity -> scatter_mean)."""
    mixed = jnp.einsum("lbsd,l->bsd", hidden_states, coef)                # (B, S, D)
    proj = mixed @ proj_w + proj_b                                        # (B, S, OUT)
    one_hot = (subword_indices[:, :, None] ==
               jnp.arange(NUM_WORDS)[None, None, :]).astype(jnp.float32)  # (B, S, NW)
    sums = jnp.einsum("bsn,bso->bno", one_hot, proj)                      # (B, NW, OUT)
    counts = one_hot.sum(axis=1)[..., None]                               # (B, NW, 1)
    return sums / jnp.maximum(counts, 1.0)                                # empty -> 0


if __name__ == "__main__":
    key = jax.random.PRNGKey(0)
    k_h, k_w, k_b, k_idx = jax.random.split(key, 4)

    # TODO(synk): the BERT encoder itself is an external pretrained transformer;
    # its per-layer hidden states are synthesized here instead of being computed.
    hidden_states = jax.random.normal(
        k_h, (NUM_LAYERS, BATCH, SEQ, EMB_DIM), dtype=jnp.float32)

    # MixedBertEmbedding parameters (module init: gamma=1.0, layer weights = ones)
    gamma = jnp.float32(1.0)
    layer_weights = jnp.ones((NUM_LAYERS,), dtype=jnp.float32)
    coef = gamma * jax.nn.softmax(layer_weights)                          # (L,)

    # Projection layer parameters (deterministic synthetic init)
    proj_w = 0.02 * jax.random.normal(k_w, (EMB_DIM, OUT_DIM), dtype=jnp.float32)
    proj_b = 0.01 * jax.random.normal(k_b, (1, OUT_DIM), dtype=jnp.float32)

    # Subword -> word indices, values in [0, NUM_WORDS)
    subword_indices = jax.random.randint(
        k_idx, (BATCH, SEQ), 0, NUM_WORDS, dtype=jnp.int32)

    out = word_encoder_forward(hidden_states, subword_indices, coef, proj_w, proj_b)
    out = jax.block_until_ready(out)

    ref = reference_forward(hidden_states, subword_indices, coef, proj_w, proj_b)
    assert out.shape == (BATCH, NUM_WORDS, OUT_DIM)
    assert jnp.allclose(out, ref, atol=2e-2, rtol=2e-2), \
        float(jnp.max(jnp.abs(out - ref)))

    print("KERNEL_OK")
</pallas_src>

<mosaic_0001>
module attributes {stable_mosaic.version = 11 : i64} {
  func.func @word_encoder_kernel(%arg0: i32, %arg1: memref<1x192xf32, #tpu.memory_space<vmem>>, %arg2: memref<1x1x192xi32, #tpu.memory_space<vmem>>, %arg3: memref<12x1x16x768xf32, #tpu.memory_space<vmem>>, %arg4: memref<768x512xf32, #tpu.memory_space<vmem>>, %arg5: memref<1x512xf32, #tpu.memory_space<vmem>>, %arg6: memref<1x8x512xf32, #tpu.memory_space<vmem>>) attributes {dimension_semantics = [#tpu.dimension_semantics<parallel>], iteration_bounds = array<i64: 2>, scalar_prefetch = 0 : i64, scratch_operands = 0 : i64, tpu.core_type = #tpu.core_type<tc>, window_params = [{pipeline_mode = #tpu.pipeline_mode<synchronous>, transform_indices = @transform_0, window_bounds = array<i64: 1, 192>}, {transform_indices = @transform_1, window_bounds = array<i64: 1, 1, 192>}, {transform_indices = @transform_2, window_bounds = array<i64: 12, 1, 16, 768>}, {pipeline_mode = #tpu.pipeline_mode<synchronous>, transform_indices = @transform_3, window_bounds = array<i64: 768, 512>}, {pipeline_mode = #tpu.pipeline_mode<synchronous>, transform_indices = @transform_4, window_bounds = array<i64: 1, 512>}, {transform_indices = @transform_5, window_bounds = array<i64: 1, 8, 512>}]} {
    %c0 = arith.constant 0 : index
    %c0_0 = arith.constant 0 : index
    %c0_1 = arith.constant 0 : index
    %0 = vector.load %arg2[%c0, %c0_0, %c0_1] : memref<1x1x192xi32, #tpu.memory_space<vmem>>, vector<1x1x192xi32>
    %1 = vector.shape_cast %0 : vector<1x1x192xi32> to vector<1x192xi32>
    %2 = tpu.iota {dimensions = array<i32: 0>} : vector<8x192xi32>
    %3 = vector.broadcast %1 : vector<1x192xi32> to vector<8x192xi32>
    %4 = arith.cmpi eq, %2, %3 : vector<8x192xi32>
    %c0_2 = arith.constant 0 : index
    %c0_3 = arith.constant 0 : index
    %5 = vector.load %arg1[%c0_2, %c0_3] : memref<1x192xf32, #tpu.memory_space<vmem>>, vector<1x192xf32>
    %cst = arith.constant 0.000000e+00 : f32
    %6 = vector.shape_cast %5 : vector<1x192xf32> to vector<1x192xf32>
    %7 = vector.broadcast %6 : vector<1x192xf32> to vector<8x192xf32>
    %8 = vector.broadcast %cst : f32 to vector<8x192xf32>
    %9 = arith.select %4, %7, %8 : vector<8x192xi1>, vector<8x192xf32>
    %10 = arith.truncf %9 : vector<8x192xf32> to vector<8x192xbf16>
    %c0_4 = arith.constant 0 : index
    %c0_5 = arith.constant 0 : index
    %c0_6 = arith.constant 0 : index
    %c0_7 = arith.constant 0 : index
    %11 = vector.load %arg3[%c0_4, %c0_5, %c0_6, %c0_7] : memref<12x1x16x768xf32, #tpu.memory_space<vmem>>, vector<12x1x16x768xf32>
    %12 = vector.shape_cast %11 : vector<12x1x16x768xf32> to vector<192x768xf32>
    %13 = arith.truncf %12 : vector<192x768xf32> to vector<192x768xbf16>
    %cst_8 = arith.constant dense<0.000000e+00> : vector<8x768xf32>
    %14 = tpu.matmul %10, %13, %cst_8 {dimension_numbers = #tpu.dot_dimension_numbers<[1], [0], [0], [1], [0, 0, 1, 1], [], []>} : vector<8x192xbf16>, vector<192x768xbf16>, vector<8x768xf32> -> vector<8x768xf32>
    %15 = arith.extui %4 : vector<8x192xi1> to vector<8x192xi32>
    %16 = arith.sitofp %15 : vector<8x192xi32> to vector<8x192xf32>
    %cst_9 = arith.constant dense<0.000000e+00> : vector<8xf32>
    %17 = vector.multi_reduction <add>, %16, %cst_9 [1] : vector<8x192xf32> to vector<8xf32>
    %18 = vector.shape_cast %17 : vector<8xf32> to vector<8x1xf32>
    %cst_10 = arith.constant 1.200000e+01 : f32
    %19 = vector.broadcast %cst_10 : f32 to vector<8x1xf32>
    %20 = arith.divf %18, %19 : vector<8x1xf32>
    %cst_11 = arith.constant 1.000000e+00 : f32
    %21 = vector.broadcast %cst_11 : f32 to vector<8x1xf32>
    %22 = arith.maximumf %20, %21 : vector<8x1xf32>
    %23 = vector.broadcast %22 : vector<8x1xf32> to vector<8x768xf32>
    %24 = arith.divf %14, %23 : vector<8x768xf32>
    %25 = arith.truncf %24 : vector<8x768xf32> to vector<8x768xbf16>
    %c0_12 = arith.constant 0 : index
    %c0_13 = arith.constant 0 : index
    %26 = vector.load %arg4[%c0_12, %c0_13] : memref<768x512xf32, #tpu.memory_space<vmem>>, vector<768x512xf32>
    %27 = arith.truncf %26 : vector<768x512xf32> to vector<768x512xbf16>
    %cst_14 = arith.constant dense<0.000000e+00> : vector<8x512xf32>
    %28 = tpu.matmul %25, %27, %cst_14 {dimension_numbers = #tpu.dot_dimension_numbers<[1], [0], [0], [1], [0, 0, 1, 1], [], []>} : vector<8x768xbf16>, vector<768x512xbf16>, vector<8x512xf32> -> vector<8x512xf32>
    %cst_15 = arith.constant 0.000000e+00 : f32
    %29 = vector.broadcast %cst_15 : f32 to vector<8x1xf32>
    %30 = arith.cmpf ogt, %20, %29 : vector<8x1xf32>
    %31 = arith.extui %30 : vector<8x1xi1> to vector<8x1xi32>
    %32 = arith.sitofp %31 : vector<8x1xi32> to vector<8x1xf32>
    %c0_16 = arith.constant 0 : index
    %c0_17 = arith.constant 0 : index
    %33 = vector.load %arg5[%c0_16, %c0_17] : memref<1x512xf32, #tpu.memory_space<vmem>>, vector<1x512xf32>
    %34 = vector.broadcast %33 : vector<1x512xf32> to vector<8x512xf32>
    %35 = arith.addf %28, %34 : vector<8x512xf32>
    %36 = vector.broadcast %32 : vector<8x1xf32> to vector<8x512xf32>
    %37 = arith.mulf %35, %36 : vector<8x512xf32>
    %c0_18 = arith.constant 0 : index
    %c0_19 = arith.constant 0 : index
    %c0_20 = arith.constant 0 : index
    %38 = vector.load %arg6[%c0_18, %c0_19, %c0_20] : memref<1x8x512xf32, #tpu.memory_space<vmem>>, vector<1x8x512xf32>
    %39 = vector.shape_cast %38 : vector<1x8x512xf32> to vector<8x512xf32>
    %40 = vector.shape_cast %37 : vector<8x512xf32> to vector<1x8x512xf32>
    tpu.vector_store %arg6[%c0_18, %c0_19, %c0_20], %40 {strides = array<i32>} : memref<1x8x512xf32, #tpu.memory_space<vmem>>, vector<1x8x512xf32>,
    return
  }
  func.func @transform_0(%arg0: i32) -> (i32, i32) {
    %c0_i32 = arith.constant 0 : i32
    %c0_i32_0 = arith.constant 0 : i32
    %c0_i32_1 = arith.constant 0 : i32
    return %c0_i32, %c0_i32_0 : i32, i32
  }
  func.func @transform_1(%arg0: i32) -> (i32, i32, i32) {
    %c0_i32 = arith.constant 0 : i32
    %c0_i32_0 = arith.constant 0 : i32
    %c0_i32_1 = arith.constant 0 : i32
    return %arg0, %c0_i32, %c0_i32_0 : i32, i32, i32
  }
  func.func @transform_2(%arg0: i32) -> (i32, i32, i32, i32) {
    %c0_i32 = arith.constant 0 : i32
    %c0_i32_0 = arith.constant 0 : i32
    %c0_i32_1 = arith.constant 0 : i32
    %c0_i32_2 = arith.constant 0 : i32
    return %c0_i32, %arg0, %c0_i32_0, %c0_i32_1 : i32, i32, i32, i32
  }
  func.func @transform_3(%arg0: i32) -> (i32, i32) {
    %c0_i32 = arith.constant 0 : i32
    %c0_i32_0 = arith.constant 0 : i32
    %c0_i32_1 = arith.constant 0 : i32
    return %c0_i32, %c0_i32_0 : i32, i32
  }
  func.func @transform_4(%arg0: i32) -> (i32, i32) {
    %c0_i32 = arith.constant 0 : i32
    %c0_i32_0 = arith.constant 0 : i32
    %c0_i32_1 = arith.constant 0 : i32
    return %c0_i32, %c0_i32_0 : i32, i32
  }
  func.func @transform_5(%arg0: i32) -> (i32, i32, i32) {
    %c0_i32 = arith.constant 0 : i32
    %c0_i32_0 = arith.constant 0 : i32
    %c0_i32_1 = arith.constant 0 : i32
    return %arg0, %c0_i32, %c0_i32_0 : i32, i32, i32
  }
}

</mosaic_0001>

<bundles_post_ra>
// kernel: tpu_custom_call.1
= control target key start
LH: loop header
LB: loop body
LE: loop exit
PB: predicated region body
PF: predicated region fallthrough
CT: control target
= control target key end

     0   :  { %s2550_s0 = inlined_call_operand.hbm [shape: f32[1,192], index: 0, kind: input, shape index: {}]   ;;  %s2551_s1 = inlined_call_operand.hbm [shape: s32[2,1,192], index: 1, kind: input, shape index: {}]   ;;  %s2552_s2 = inlined_call_operand.hbm [shape: f32[12,2,16,768], index: 2, kind: input, shape index: {}]   ;;  %s2553_s3 = inlined_call_operand.hbm [shape: f32[768,512], index: 3, kind: input, shape index: {}]   ;;  %s2554_s4 = inlined_call_operand.hbm [shape: f32[1,512], index: 4, kind: input, shape index: {}]   ;;  %s2555_s5 = inlined_call_operand.hbm [shape: f32[2,8,512], index: 5, kind: output, shape index: {}]  }
   0x1   :  { %2561 = sst [smem:[#allocation19_spill]] %s2550_s0 }
   0x2   :  { %10 = vsyncpa [#allocation3], 0 }
   0x3   :  { %11 = vsyncpa [#allocation6], 0 }
   0x4   :  { %13 = vsyncpa [#allocation6 + $0x1], 0 }
   0x5   :  { %14 = vsyncpa [#allocation9], 0 }
   0x6   :  { %15 = vsyncpa [#allocation4], 0 }
   0x7   :  { %17 = vsyncpa [#allocation4 + $0x1], 0  ;;  %s2088_s18 = smov 0   ;;  %s2090_s19 = smov 0  }
   0x8   :  { %s2092_s20 = smov 0   ;;  %s2094_s21 = smov 0  }
   0x9 LB: > { %s2109_s22 = sadd.s32 4294967295, %s2042_s21   ;;  %s1731_s23 = sadd.s32 4294967294, %s2042_s21   ;;  %s2042_s21 = sphi %s2094_s21, %s2587_s21   ;;  %s2038_s20 = sphi %s2092_s20, %s2586_s20   ;;  %s2034_s19 = sphi %s2090_s19, %s2585_s19   ;;  %s2030_s18 = sphi %s2088_s18, %s2584_s18  }
   0xa   : > { %s2113_s24 = sadd.s32 1, %s2042_s21   ;;  %s51_s25 = sadd.s32 1, %s2038_s20 }
   0xb   : > { %s48_s26 = ssub.s32 %s2042_s21, %s2113_s24  ;;  %p58_p0 = scmp.ne.s32.totalorder %s2038_s20, %s2034_s19 }
   0xc   : > { %p49_p1 = scmp.eq.s32.totalorder %s48_s26, 0  ;;  %p59_p2 = scmp.eq.s32.totalorder %s2042_s21, 0 }
   0xd   : > { %p64_p3 = scmp.ne.s32.totalorder %s2034_s19, %s2030_s18  ;;  %p2556_p4 = scmp.eq.s32.totalorder %s2109_s22, 0 }
   0xe   : > { %s2125_s27 = scalar_select %p49_p1, %s2038_s20, %s51_s25  }
   0xf   : > { %p2127_p5 = por %p59_p2, %p58_p0  ;;  %p2133_p6 = por %p2556_p4, %p64_p3 }
  0x10   : > { %p156_p7 = scmp.eq.s32.totalorder %s2109_s22, 1  ;;  %p162_p8 = scmp.eq.s32.totalorder %s1731_s23, 1 }
  0x11   : > { %s2563_s29 = scalar_select %p2133_p6, 1, 0 }
  0x12   : > { %p1732_p9 = scmp.ge.s32.totalorder %s2042_s21, 1  ;;  %p169_p10 = scmp.lt.s32.totalorder %s2042_s21, 3 }
  0x13   : > { %p2140_p11 = por %p156_p7, %p58_p0  ;;  %p2144_p12 = por %p162_p8, %p64_p3 }
  0x14   : > { %p2148_p13 = pnand %p1732_p9, %p169_p10  ;;  %s2044_s8 = smov [#allocation8]  }
  0x15   : > { %s2564_s30 = scalar_select %p2140_p11, 1, 0 }
  0x16   : > { %s2565_s6 = scalar_select %p2144_p12, 1, 0 }
  0x17   : > { %p1799_p1 = pneg %p2148_p13  ;;  %s192_s9 = sshll.u32 %s2044_s8, 4  ;;  %s193_s9 = int_to_ptr.vmem [resolvable:$true] %s192_s9 }
  0x18   : > { %s2045_s11 = smov [#allocation2]   ;;  %s1877_s13 = scalar_lea.vmem %s193_s9, 49152 }
  0x19   : > { %p2156_p2 = pnand %p1799_p1, %p2556_p4  ;;  %s182_s12 = sshll.u32 %s2045_s11, 4  ;;  %s183_s12 = int_to_ptr.vmem [resolvable:$true] %s182_s12 }
  0x1a   : > { %p1878_p3 = scmp.ne.s32.totalorder %s193_s9, %s1877_s13  ;;  %p1885_p9 = scmp.lt.s32.totalorder %s193_s9, %s193_s9 }
  0x1b   : > { %p1868_p0 = pneg %p2156_p2  ;;  %p1886_p10 = scmp.lt.s32.totalorder %s1877_s13, %s1877_s13 }
  0x1d   : > { %p1880_p7 = pnand %p1878_p3, %p1868_p0  ;;  %p1887_p12 = por %p1886_p10, %p1885_p9 }
  0x1f   : > { %p1881_p8 = pneg %p1880_p7 }
  0x21   : > { %p1888_p1 = pnand %p1887_p12, %p1881_p8 }
  0x23   : > { %1891 = shalt.err (!%p1888_p1)
}
  0x24   : > { %s2046_s14 = smov 512   ;;  %s2047_s15 = smov 32  }
  0x25   : > { %1805 = dma.hbm_to_vmem [thread:$0]  (!%p2156_p2), %s2553_s3, 49152, %s193_s9, [#allocation9], %s2046_s14, %s2046_s14, %s2047_s15  }
  0x26   : > { %s1903_s23 = scalar_lea.vmem %s183_s12, 32  ;;  %p1911_p11 = scmp.lt.s32.totalorder %s183_s12, %s183_s12 }
  0x27   : > { %p1904_p4 = scmp.ne.s32.totalorder %s183_s12, %s1903_s23  ;;  %p1912_p6 = scmp.lt.s32.totalorder %s1903_s23, %s1903_s23 }
  0x29   : > { %p1906_p3 = pnand %p1904_p4, %p1868_p0  ;;  %p1913_p9 = por %p1912_p6, %p1911_p11 }
  0x2b   : > { %p1907_p7 = pneg %p1906_p3 }
  0x2d   : > { %p1914_p12 = pnand %p1913_p9, %p1907_p7 }
  0x2f   : > { %1917 = shalt.err (!%p1914_p12)
}
  0x30   : > { %s2568_s0 = sld [smem:[#allocation19_spill]]  ;;  %s2048_s8 = smov [#allocation10]  }
  0x31   : > { %s206_s9 = sshll.u32 %s2048_s8, 4  ;;  %s207_s9 = int_to_ptr.vmem [resolvable:$true] %s206_s9 }
  0x32   : > { %s1929_s11 = scalar_lea.vmem %s207_s9, 64  ;;  %p1937_p1 = scmp.lt.s32.totalorder %s207_s9, %s207_s9 }
  0x33   : > { %p1930_p8 = scmp.ne.s32.totalorder %s207_s9, %s1929_s11  ;;  %p1938_p6 = scmp.lt.s32.totalorder %s1929_s11, %s1929_s11 }
  0x35   : > { %p1932_p4 = pnand %p1930_p8, %p1868_p0  ;;  %p1939_p11 = por %p1938_p6, %p1937_p1 }
  0x36   : > { %1802 = dma.hbm_to_vmem [thread:$0]  (!%p2156_p2), %s2568_s0, 32, %s183_s12, [#allocation3]  }
  0x37   : > { %p1933_p10 = pneg %p1932_p4 }
  0x39   : > { %p1940_p3 = pnand %p1939_p11, %p1933_p10 }
  0x3b   : > { %1943 = shalt.err (!%p1940_p3)
}
  0x3c   : > { %1808 = dma.hbm_to_vmem [thread:$0]  (!%p2156_p2), %s2554_s4, 64, %s207_s9, [#allocation9]  }
  0x3d   : > { %p2560_p7 = scmp.ge.s32.totalorder %s2042_s21, 2 }
  0x3e   : > { %s217_s12 = sand.u32 (!%p2560_p7), 1, %s2042_s21   ;;  %s2559_s15 = sand.u32 (!%p2560_p7), 1, %s2038_s20  }
  0x3f   : > { %213 = sbr.rel (%p2560_p7) target bundleno = 101 (0x65), region = 28  ;;  %s1737_s16 = sshll.u32 (!%p2560_p7), %s2559_s15, 1 }
  0x40   : > { %s1769_s17 = sshll.u32 (!%p2560_p7), %s2042_s21, 5  ;;  %s221_s26 = scalar_lea.vmem (!%p2560_p7), [#allocation5], %s1737_s16 }
  0x41   : > { %s2197_s25 = scalar_lea.hbm (!%p2560_p7), %s2551_s1, %s1769_s17  ;;  %s229_s8 = sshll.u32 (!%p2560_p7), %s221_s26, 4  ;;  %s230_s8 = int_to_ptr.vmem [resolvable:$true] %s229_s8 }
  0x42   : > { %s2199_s9 = scalar_lea.sflag (!%p2560_p7), [#allocation6], %s217_s12  ;;  %s1944_s11 = scalar_lea.hbm (!%p2560_p7), %s2197_s25, 32 }
  0x43   : > { %p1945_p2 = scmp.ne.s32.totalorder (!%p2560_p7), %s2197_s25, %s1944_s11  ;;  %s1948_s15 = scalar_lea.hbm (!%p2560_p7), %s2551_s1, 64 }
  0x44   : > { %p1949_p12 = scmp.lt.s32.totalorder %s2197_s25, %s2551_s1  ;;  %p1950_p8 = scmp.lt.s32.totalorder %s1948_s15, %s1944_s11 }
  0x45   : > { %p1946_p0 = pnand %p1945_p2, %p2127_p5 }
  0x46   : > { %p1951_p4 = por %p1950_p8, %p1949_p12 }
  0x47   : > { %p1947_p9 = pneg %p1946_p0 }
  0x49   : > { %p1952_p10 = pnand %p1951_p4, %p1947_p9 }
  0x4b   : > { %1955 = shalt.err (!%p1952_p10)
}
  0x4c   : > { %s1956_s16 = scalar_lea.vmem %s230_s8, 32  ;;  %s2049_s12 = smov [#allocation5]  }
  0x4d   : > { %p1957_p1 = scmp.ne.s32.totalorder %s230_s8, %s1956_s16  ;;  %s1960_s23 = sshll.u32 %s2049_s12, 4  ;;  %s1961_s23 = int_to_ptr.vmem [resolvable:$false] %s1960_s23 }
  0x4e   : > { %s1962_s26 = scalar_lea.vmem %s1961_s23, 64  ;;  %p1963_p3 = scmp.lt.s32.totalorder %s230_s8, %s1961_s23 }
  0x4f   : > { %p1958_p6 = pnand %p1957_p1, %p2127_p5  ;;  %p1964_p2 = scmp.lt.s32.totalorder %s1962_s26, %s1956_s16 }
  0x51   : > { %p1959_p11 = pneg %p1958_p6  ;;  %p1965_p0 = por %p1964_p2, %p1963_p3 }
  0x53   : > { %p1966_p7 = pnand %p1965_p0, %p1959_p11 }
  0x55   : > { %1969 = shalt.err (!%p1966_p7)
}
  0x56   : > { %1780 = dma.hbm_to_vmem [thread:$0]  (%p2127_p5), %s2197_s25, 32, %s230_s8, %s2199_s9  }
  0x57   : > { %s2569_s15 = sand.u32 1, %s2038_s20   ;;  %s2050_s13 = smov 3072  }
  0x58   : > { %s1771_s11 = smul.u32 1152, %s2569_s15  ;;  %1782 = sst [smem:[#allocation13]] (%p2127_p5), %s2050_s13 }
  0x59   : > { %s1772_s14 = smul.u32 1536, %s2042_s21  ;;  %s2051_s25 = smov 1536  }
  0x5a   : > { %s1781_s10 = scalar_select %p2127_p5, [#allocation0], [#allocation14] }
  0x5b   : > { %s240_s17 = scalar_lea.vmem [#allocation7], %s1771_s11  ;;  %1783 = sst [smem:[#allocation13 + $0x1]] (%p2127_p5), %s2051_s25 }
  0x5c   : > { %s259_s16 = sshll.u32 %s240_s17, 4  ;;  %s251_s8 = sld [smem:[%s1781_s10]]   ;;  %s260_s16 = int_to_ptr.vmem [resolvable:$true] %s259_s16 }
  0x5d   : > { %s2052_s12 = smov 2   ;;  %s2053_s23 = smov 768  }
  0x5e   : > { %1784 = sst [smem:[#allocation13 + $0x2]] (%p2127_p5), %s2052_s12  ;;  %s246_s13 = scalar_lea.hbm %s2552_s2, %s1772_s14 }
  0x5f   : > { %1785 = sst [smem:[#allocation13 + $0x3]] (%p2127_p5), %s2053_s23  ;;  %s2054_s11 = smov 48  }
  0x60   : > { %1786 = sst [smem:[#allocation13 + $0x4]] (%p2127_p5), %s2053_s23  ;;  %s2055_s25 = smov 131072  }
  0x61   : > { %1787 = sst [smem:[#allocation13 + $0x5]] (%p2127_p5), %s2054_s11 }
  0x62   : > { %s1741_s17 = sshll.u32 %s251_s8, 26 }
  0x63   : > { %s1742_s0 = sadd.s32 134217728, %s1741_s17 }
  0x64   : > { %1788 = dma.general (%p2127_p5), %s246_s13, 18432, %s260_s16, %s2199_s9, %s2055_s25, [#allocation13], %s1742_s0, 0  }
  0x65 PF: > { %284 = sbr.rel (%p2148_p13) target bundleno = 710 (0x2c6), region = 40  ;;  %p2570_p7 = scmp.eq.s32.totalorder (!%p2148_p13), %s2109_s22, 0 }
  0x6a   : > { %2013 = dma.done.wait (%p2570_p7), [#allocation3], 32   ;;  %p2571_p9 = pmov %p2570_p7 }
  0x6b   : > { %s290_s14 = sand.u32 1, %s2109_s22   ;;  %s2249_s10 = sand.u32 1, %s2034_s19  }
  0x6c   : > { %2015 = vsyncadd (%p2571_p9), [#allocation3], 4294967264  ;;  %s1745_s8 = sshll.u32 %s2249_s10, 1  ;;  %s291_s28 = scalar_lea.sflag [#allocation6], %s290_s14 }
  0x6d   : > { %s2252_s0 = scalar_lea.vmem [#allocation5], %s1745_s8  ;;  %p2572_p5 = scmp.ne.s32.totalorder %s2563_s29, 0 }
  0x6f   : > { %2017 = dma.done.wait (%p2572_p5), %s291_s28, 18464  }
  0x70   : > { %2019 = vsyncadd (%p2572_p5), %s291_s28, 4294948832  ;;  %s1773_s7 = smul.u32 1152, %s2249_s10  ;;  %p2573_p13 = pmov %p2570_p7 }
  0x72   : > { %s2259_s9 = scalar_lea.vmem [#allocation7], %s1773_s7 }
  0x73   : > { %2021 = dma.done.wait (%p2573_p13), [#allocation9], 49216   ;;  %p2574_p12 = pmov %p2570_p7 }
  0x74   : > { %v458_v0 = vld [vmem:[%s2259_s9 + $0x2a8] sm:$0xff]  ;;  %v464_v1 = vld [vmem:[%s2259_s9 + $0x2d8] sm:$0xff]  ;;  %v457_v5 = vld [vmem:[%s2259_s9 + $0x2a0] sm:$0xff]  ;;  %vm589_vm1 = vcmask 523264   ;;  %s1748_s29 = sshll.u32 %s2249_s10, 5  ;;  %s1770_s12 = sshll.u32 %s2109_s22, 9 }
  0x75   : > { %2023 = vsyncadd (%p2574_p12), [#allocation9], 4294918080  ;;  %v460_v2 = vld [vmem:[%s2259_s9 + $0x2b8] sm:$0xff]  ;;  %v560_v3 = vpack.c.bf16 %v464_v1, %v458_v0  ;;  %v466_v4 = vld [vmem:[%s2259_s9 + $0x2e8] sm:$0xff]  ;;  %s2506_s16 = scalar_lea.vmem [#allocation11], %s1748_s29  ;;  %s1608_s13 = scalar_lea.hbm %s2555_s5, %s1770_s12 }
  0x76   : > { %v463_v6 = vld [vmem:[%s2259_s9 + $0x2d0] sm:$0xff]  ;;  %v562_v7 = vpack.c.bf16 %v466_v4, %v460_v2  ;;  %v465_v10 = vld [vmem:[%s2259_s9 + $0x2e0] sm:$0xff]  ;;  %v446_v11 = vld [vmem:[%s2259_s9 + $0x248] sm:$0xff]  ;;  %s1610_s23 = sshll.u32 %s2506_s16, 4  ;;  %s1596_s11 = scalar_lea.sflag [#allocation4], %s2249_s10  ;;  %s1611_s23 = int_to_ptr.vmem [resolvable:$true] %s1610_s23 }
  0x77   : > { %v559_v8 = vpack.c.bf16 %v463_v6, %v457_v5  ;;  %v459_v9 = vld [vmem:[%s2259_s9 + $0x2b0] sm:$0xff]  ;;  %593 = vmatprep.subr.bf16.mxu0 %v560_v3  ;;  %v452_v13 = vld [vmem:[%s2259_s9 + $0x278] sm:$0xff]  ;;  %v454_v15 = vld [vmem:[%s2259_s9 + $0x288] sm:$0xff]  ;;  %s1970_s17 = scalar_lea.vmem %s1611_s23, 512  ;;  %p2581_p4 = scmp.ne.s32.totalorder %s2564_s30, 0 }
  0x78   : > { %v561_v12 = vpack.c.bf16 %v465_v10, %v459_v9  ;;  %v448_v14 = vld [vmem:[%s2259_s9 + $0x258] sm:$0xff]  ;;  %634 = vmatprep.subr.bf16.mxu1 %v562_v7  ;;  %v554_v16 = vpack.c.bf16 %v452_v13, %v446_v11  ;;  %v445_v18 = vld [vmem:[%s2259_s9 + $0x240] sm:$0xff]  ;;  %v451_v19 = vld [vmem:[%s2259_s9 + $0x270] sm:$0xff]  ;;  %p1971_p8 = scmp.ne.s32.totalorder %s1611_s23, %s1970_s17  ;;  %s2057_s22 = smov [#allocation11]  }
  0x79   : > { %594 = vmatpush1.bf16.msra.mxu0 %v559_v8  ;;  %v556_v17 = vpack.c.bf16 %v454_v15, %v448_v14  ;;  %v447_v20 = vld [vmem:[%s2259_s9 + $0x250] sm:$0xff]  ;;  %v553_v21 = vpack.c.bf16 %v451_v19, %v445_v18  ;;  %v453_v22 = vld [vmem:[%s2259_s9 + $0x280] sm:$0xff]  ;;  %v434_v23 = vld [vmem:[%s2259_s9 + $0x1e8] sm:$0xff]  ;;  %s1974_s25 = sshll.u32 %s2057_s22, 4  ;;  %s1975_s25 = int_to_ptr.vmem [resolvable:$false] %s1974_s25 }
  0x7a   : > { %635 = vmatpush1.bf16.msra.mxu1 %v561_v12  ;;  %v440_v24 = vld [vmem:[%s2259_s9 + $0x218] sm:$0xff]  ;;  %595 = vmatprep.subr.bf16.mxu0 %v554_v16  ;;  %v555_v25 = vpack.c.bf16 %v453_v22, %v447_v20  ;;  %v442_v28 = vld [vmem:[%s2259_s9 + $0x228] sm:$0xff]  ;;  %v433_v29 = vld [vmem:[%s2259_s9 + $0x1e0] sm:$0xff]  ;;  %v345_v16 = vlaneseq  ;;  %p1972_p10 = pnand %p1971_p8, %p2581_p4  ;;  %s1976_s14 = scalar_lea.vmem %s1975_s25, 1024 }
  0x7b   : > { %636 = vmatprep.subr.bf16.mxu1 %v556_v17  ;;  %v548_v26 = vpack.c.bf16 %v440_v24, %v434_v23  ;;  %v436_v27 = vld [vmem:[%s2259_s9 + $0x1f8] sm:$0xff]  ;;  %v439_v31 = vld [vmem:[%s2259_s9 + $0x210] sm:$0xff]  ;;  %v441_v33 = vld [vmem:[%s2259_s9 + $0x220] sm:$0xff]  ;;  %p1977_p6 = scmp.lt.s32.totalorder %s1611_s23, %s1975_s25  ;;  %p1978_p11 = scmp.lt.s32.totalorder %s1976_s14, %s1970_s17 }
  0x7c   : > { %v550_v30 = vpack.c.bf16 %v442_v28, %v436_v27  ;;  %v435_v32 = vld [vmem:[%s2259_s9 + $0x1f0] sm:$0xff]  ;;  %v547_v34 = vpack.c.bf16 %v439_v31, %v433_v29  ;;  %v422_v35 = vld [vmem:[%s2259_s9 + $0x188] sm:$0xff]  ;;  %v428_v36 = vld [vmem:[%s2259_s9 + $0x1b8] sm:$0xff]  ;;  %v2328_v29 = vshrl.u32 %v345_v16, 7  ;;  %p1973_p1 = pneg %p1972_p10 }
  0x7d   : > { %596 = vmatpush1.bf16.msra.mxu0 %v553_v21  ;;  %v424_v37 = vld [vmem:[%s2259_s9 + $0x198] sm:$0xff]  ;;  %v549_v38 = vpack.c.bf16 %v441_v33, %v435_v32  ;;  %v542_v39 = vpack.c.bf16 %v428_v36, %v422_v35  ;;  %v430_v40 = vld [vmem:[%s2259_s9 + $0x1c8] sm:$0xff]  ;;  %v421_v41 = vld [vmem:[%s2259_s9 + $0x180] sm:$0xff]  ;;  %p1979_p3 = por %p1978_p11, %p1977_p6 }
  0x7e   : > { %637 = vmatpush1.bf16.msra.mxu1 %v555_v25  ;;  %597 = vmatprep.subr.bf16.mxu0 %v548_v26  ;;  %v427_v42 = vld [vmem:[%s2259_s9 + $0x1b0] sm:$0xff]  ;;  %v544_v43 = vpack.c.bf16 %v430_v40, %v424_v37  ;;  %v429_v45 = vld [vmem:[%s2259_s9 + $0x1c0] sm:$0xff]  ;;  %v410_v46 = vld [vmem:[%s2259_s9 + $0x128] sm:$0xff] }
  0x7f   : > { %638 = vmatprep.subr.bf16.mxu1 %v550_v30  ;;  %v423_v44 = vld [vmem:[%s2259_s9 + $0x190] sm:$0xff]  ;;  %v416_v47 = vld [vmem:[%s2259_s9 + $0x158] sm:$0xff]  ;;  %v418_v49 = vld [vmem:[%s2259_s9 + $0x168] sm:$0xff]  ;;  %v541_v50 = vpack.c.bf16 %v427_v42, %v421_v41  ;;  %p1980_p2 = pnand %p1979_p3, %p1973_p1 }
  0x80   : > { %v412_v48 = vld [vmem:[%s2259_s9 + $0x138] sm:$0xff]  ;;  %v543_v51 = vpack.c.bf16 %v429_v45, %v423_v44  ;;  %v536_v52 = vpack.c.bf16 %v416_v47, %v410_v46  ;;  %v409_v53 = vld [vmem:[%s2259_s9 + $0x120] sm:$0xff]  ;;  %v415_v54 = vld [vmem:[%s2259_s9 + $0x150] sm:$0xff]  ;;  %v2342_v45 = vsub.s32 1, %v2328_v29  ;;  %v2345_v46 = vsub.s32 0, %v2328_v29 }
  0x81   : > { %598 = vmatpush1.bf16.msra.mxu0 %v547_v34  ;;  %v411_v55 = vld [vmem:[%s2259_s9 + $0x130] sm:$0xff]  ;;  %v538_v56 = vpack.c.bf16 %v418_v49, %v412_v48  ;;  %v417_v57 = vld [vmem:[%s2259_s9 + $0x160] sm:$0xff]  ;;  %v398_v58 = vld [vmem:[%s2259_s9 + $0xc8] sm:$0xff]  ;;  %v535_v62 = vpack.c.bf16 %v415_v54, %v409_v53 }
  0x82   : > { %639 = vmatpush1.bf16.msra.mxu1 %v549_v38  ;;  %599 = vmatprep.subr.bf16.mxu0 %v542_v39  ;;  %v404_v59 = vld [vmem:[%s2259_s9 + $0xf8] sm:$0xff]  ;;  %v406_v61 = vld [vmem:[%s2259_s9 + $0x108] sm:$0xff]  ;;  %v537_v63 = vpack.c.bf16 %v417_v57, %v411_v55  ;;  %v397_v1 = vld [vmem:[%s2259_s9 + $0xc0] sm:$0xff] }
  0x83   : > { %640 = vmatprep.subr.bf16.mxu1 %v544_v43  ;;  %v400_v60 = vld [vmem:[%s2259_s9 + $0xd8] sm:$0xff]  ;;  %v530_v0 = vpack.c.bf16 %v404_v59, %v398_v58  ;;  %v403_v2 = vld [vmem:[%s2259_s9 + $0xf0] sm:$0xff]  ;;  %v405_v5 = vld [vmem:[%s2259_s9 + $0x100] sm:$0xff] }
  0x84   : > { %v399_v3 = vld [vmem:[%s2259_s9 + $0xd0] sm:$0xff]  ;;  %v532_v4 = vpack.c.bf16 %v406_v61, %v400_v60  ;;  %v386_v6 = vld [vmem:[%s2259_s9 + $0x68] sm:$0xff]  ;;  %v392_v7 = vld [vmem:[%s2259_s9 + $0x98] sm:$0xff]  ;;  %v529_v10 = vpack.c.bf16 %v403_v2, %v397_v1 }
  0x85   : > { %600 = vmatpush1.bf16.msra.mxu0 %v541_v50  ;;  %v388_v8 = vld [vmem:[%s2259_s9 + $0x78] sm:$0xff]  ;;  %v394_v9 = vld [vmem:[%s2259_s9 + $0xa8] sm:$0xff]  ;;  %v531_v11 = vpack.c.bf16 %v405_v5, %v399_v3  ;;  %v524_v12 = vpack.c.bf16 %v392_v7, %v386_v6  ;;  %v385_v13 = vld [vmem:[%s2259_s9 + $0x60] sm:$0xff] }
  0x86   : > { %641 = vmatpush1.bf16.msra.mxu1 %v543_v51  ;;  %601 = vmatprep.subr.bf16.mxu0 %v536_v52  ;;  %v391_v14 = vld [vmem:[%s2259_s9 + $0x90] sm:$0xff]  ;;  %v526_v17 = vpack.c.bf16 %v394_v9, %v388_v8  ;;  %v393_v18 = vld [vmem:[%s2259_s9 + $0xa0] sm:$0xff]  ;;  %v374_v19 = vld [vmem:[%s2259_s9 + $0x8] sm:$0xff] }
  0x87   : > { %642 = vmatprep.subr.bf16.mxu1 %v538_v56  ;;  %v387_v15 = vld [vmem:[%s2259_s9 + $0x70] sm:$0xff]  ;;  %v380_v20 = vld [vmem:[%s2259_s9 + $0x38] sm:$0xff]  ;;  %v382_v22 = vld [vmem:[%s2259_s9 + $0x48] sm:$0xff]  ;;  %v523_v23 = vpack.c.bf16 %v391_v14, %v385_v13  ;;  %v2056_v13 = vmov 0.0  }
  0x88   : > { %v376_v21 = vld [vmem:[%s2259_s9 + $0x18] sm:$0xff]  ;;  %v525_v24 = vpack.c.bf16 %v393_v18, %v387_v15  ;;  %v518_v25 = vpack.c.bf16 %v380_v20, %v374_v19  ;;  %v373_v26 = vld [vmem:[%s2259_s9] sm:$0xff]  ;;  %v379_v27 = vld [vmem:[%s2259_s9 + $0x30] sm:$0xff] }
  0x89   : > { %602 = vmatpush1.bf16.msra.mxu0 %v535_v62  ;;  %v375_v28 = vld [vmem:[%s2259_s9 + $0x10] sm:$0xff]  ;;  %v520_v30 = vpack.c.bf16 %v382_v22, %v376_v21  ;;  %v381_v31 = vld [vmem:[%s2259_s9 + $0x40] sm:$0xff]  ;;  %v506_v32 = vld [vmem:[%s2259_s9 + $0x428] sm:$0xff]  ;;  %v517_v36 = vpack.c.bf16 %v379_v27, %v373_v26 }
  0x8a   : > { %643 = vmatpush1.bf16.msra.mxu1 %v537_v63  ;;  %603 = vmatprep.subr.bf16.mxu0 %v530_v0  ;;  %v512_v33 = vld [vmem:[%s2259_s9 + $0x458] sm:$0xff]  ;;  %v514_v35 = vld [vmem:[%s2259_s9 + $0x468] sm:$0xff]  ;;  %v505_v37 = vld [vmem:[%s2259_s9 + $0x420] sm:$0xff]  ;;  %v519_v40 = vpack.c.bf16 %v381_v31, %v375_v28 }
  0x8b   : > { %644 = vmatprep.subr.bf16.mxu1 %v532_v4  ;;  %v508_v34 = vld [vmem:[%s2259_s9 + $0x438] sm:$0xff]  ;;  %v511_v38 = vld [vmem:[%s2259_s9 + $0x450] sm:$0xff]  ;;  %v584_v41 = vpack.c.bf16 %v512_v33, %v506_v32  ;;  %v513_v42 = vld [vmem:[%s2259_s9 + $0x460] sm:$0xff] }
  0x8c   : > { %v507_v39 = vld [vmem:[%s2259_s9 + $0x430] sm:$0xff]  ;;  %v494_v43 = vld [vmem:[%s2259_s9 + $0x3c8] sm:$0xff]  ;;  %v500_v44 = vld [vmem:[%s2259_s9 + $0x3f8] sm:$0xff]  ;;  %v586_v47 = vpack.c.bf16 %v514_v35, %v508_v34  ;;  %v583_v50 = vpack.c.bf16 %v511_v38, %v505_v37 }
  0x8d   : > { %604 = vmatpush1.bf16.msra.mxu0 %v529_v10  ;;  %v496_v48 = vld [vmem:[%s2259_s9 + $0x3d8] sm:$0xff]  ;;  %v502_v49 = vld [vmem:[%s2259_s9 + $0x408] sm:$0xff]  ;;  %v585_v51 = vpack.c.bf16 %v513_v42, %v507_v39  ;;  %v578_v52 = vpack.c.bf16 %v500_v44, %v494_v43  ;;  %v493_v53 = vld [vmem:[%s2259_s9 + $0x3c0] sm:$0xff] }
  0x8e   : > { %645 = vmatpush1.bf16.msra.mxu1 %v531_v11  ;;  %605 = vmatprep.subr.bf16.mxu0 %v524_v12  ;;  %v344_v54 = vld [vmem:[%s2252_s0] sm:$0x3]  ;;  %v357_v55 = vld [vmem:[#allocation2] sm:$0x3]  ;;  %v499_v56 = vld [vmem:[%s2259_s9 + $0x3f0] sm:$0xff]  ;;  %v580_v62 = vpack.c.bf16 %v502_v49, %v496_v48 }
  0x8f   : > { %646 = vmatprep.subr.bf16.mxu1 %v526_v17  ;;  %v495_v57 = vld [vmem:[%s2259_s9 + $0x3d0] sm:$0xff]  ;;  %v501_v58 = vld [vmem:[%s2259_s9 + $0x400] sm:$0xff]  ;;  %v354_v59 = vrot.slane %v344_v54, %v2342_v45  ;;  %v366_v60 = vrot.slane %v357_v55, %v2342_v45  ;;  %v350_v61 = vrot.slane %v344_v54, %v2345_v46  ;;  %v482_v63 = vld [vmem:[%s2259_s9 + $0x368] sm:$0xff]  ;;  %v577_v4 = vpack.c.bf16 %v499_v56, %v493_v53 }
  0x90   : > { %v488_v0 = vld [vmem:[%s2259_s9 + $0x398] sm:$0xff]  ;;  %v490_v2 = vld [vmem:[%s2259_s9 + $0x3a8] sm:$0xff]  ;;  %v579_v5 = vpack.c.bf16 %v501_v58, %v495_v57  ;;  %v481_v9 = vld [vmem:[%s2259_s9 + $0x360] sm:$0xff]  ;;  %v362_v35 = vrot.slane %v357_v55, %v2345_v46 }
  0x91   : > { %606 = vmatpush1.bf16.msra.mxu0 %v523_v23  ;;  %v484_v1 = vld [vmem:[%s2259_s9 + $0x378] sm:$0xff]  ;;  %vm2362_vm0 = vcmp.eq.s32.totalorder %v2328_v29, %v354_v59  ;;  %vm2369_vm2 = vcmp.eq.s32.totalorder %v2328_v29, %v350_v61  ;;  %v572_v8 = vpack.c.bf16 %v488_v0, %v482_v63  ;;  %v487_v10 = vld [vmem:[%s2259_s9 + $0x390] sm:$0xff]  ;;  %v489_v17 = vld [vmem:[%s2259_s9 + $0x3a0] sm:$0xff] }
  0x92   : > { %647 = vmatpush1.bf16.msra.mxu1 %v525_v24  ;;  %607 = vmatprep.subr.bf16.mxu0 %v518_v25  ;;  %v370_v6 = vsel %vm2362_vm0, %v366_v60, 0.0  ;;  %v483_v11 = vld [vmem:[%s2259_s9 + $0x370] sm:$0xff]  ;;  %v1761_v14 = vsel %vm2369_vm2, 1.0, %v2056_v13  ;;  %v1762_v15 = vsel %vm2362_vm0, 1.0, %v2056_v13  ;;  %v574_v16 = vpack.c.bf16 %v490_v2, %v484_v1  ;;  %v470_v18 = vld [vmem:[%s2259_s9 + $0x308] sm:$0xff]  ;;  %v476_v19 = vld [vmem:[%s2259_s9 + $0x338] sm:$0xff] }
  0x93   : > { %648 = vmatprep.subr.bf16.mxu1 %v520_v30  ;;  %v2376_v12 = vpack.c.bf16 %v370_v6, %v370_v6  ;;  %v720_v20 = vsel %vm589_vm1, %v1762_v15, 0.0  ;;  %v472_v21 = vld [vmem:[%s2259_s9 + $0x318] sm:$0xff]  ;;  %v478_v22 = vld [vmem:[%s2259_s9 + $0x348] sm:$0xff]  ;;  %v571_v24 = vpack.c.bf16 %v487_v10, %v481_v9  ;;  %v573_v25 = vpack.c.bf16 %v489_v17, %v483_v11  ;;  %v469_v27 = vld [vmem:[%s2259_s9 + $0x300] sm:$0xff] }
  0x94   : > { %v721_v23 = vadd.f32 %v1761_v14, %v720_v20  ;;  %v566_v26 = vpack.c.bf16 %v476_v19, %v470_v18  ;;  %v475_v28 = vld [vmem:[%s2259_s9 + $0x330] sm:$0xff]  ;;  %v568_v31 = vpack.c.bf16 %v478_v22, %v472_v21  ;;  %v477_v32 = vld [vmem:[%s2259_s9 + $0x340] sm:$0xff]  ;;  %v462_v33 = vld [vmem:[%s2259_s9 + $0x2c8] sm:$0xff]  ;;  %v2405_v43 = vpack.c.bf16 %v362_v35, %v362_v35 }
  0x95   : > { %608 = vmatpush1.bf16.msra.mxu0 %v517_v36  ;;  %1749 = vmatprep.mubr.msk.bf16.mxu0 %vm589_vm1, %v2376_v12  ;;  %v471_v30 = vld [vmem:[%s2259_s9 + $0x310] sm:$0xff]  ;;  %v468_v34 = vld [vmem:[%s2259_s9 + $0x2f8] sm:$0xff]  ;;  %v565_v36 = vpack.c.bf16 %v475_v28, %v469_v27  ;;  %v461_v39 = vld [vmem:[%s2259_s9 + $0x2c0] sm:$0xff] }
  0x96   : > { %649 = vmatpush1.bf16.msra.mxu1 %v519_v40  ;;  %617 = vmatprep.subr.bf16.mxu0 %v584_v41  ;;  %v567_v37 = vpack.c.bf16 %v477_v32, %v471_v30  ;;  %v564_v38 = vpack.c.bf16 %v468_v34, %v462_v33  ;;  %v467_v40 = vld [vmem:[%s2259_s9 + $0x2f0] sm:$0xff]  ;;  %v450_v41 = vld [vmem:[%s2259_s9 + $0x268] sm:$0xff]  ;;  %v456_v42 = vld [vmem:[%s2259_s9 + $0x298] sm:$0xff] }
  0x97   : > { %658 = vmatprep.subr.bf16.mxu1 %v586_v47  ;;  %1753 = vmatprep.mubr.msk.bf16.mxu1 %vm589_vm1, %v2376_v12  ;;  %vm2410_vm3 = vmpackc.low %vm2369_vm2, %vm2369_vm2  ;;  %v563_v47 = vpack.c.bf16 %v467_v40, %v461_v39  ;;  %v449_v48 = vld [vmem:[%s2259_s9 + $0x260] sm:$0xff]  ;;  %v455_v49 = vld [vmem:[%s2259_s9 + $0x290] sm:$0xff] }
  0x98   : > { %722 = vadd.xlane.f32.xlu0 %v721_v23  ;;  %v801_v53 = vld [vmem:[#allocation8 + $0x1e8] sm:$0xff]  ;;  %v444_v54 = vld [vmem:[%s2259_s9 + $0x238] sm:$0xff]  ;;  %v796_v56 = vld [vmem:[#allocation8 + $0x1c0] sm:$0xff]  ;;  %v557_v60 = vpack.c.bf16 %v455_v49, %v449_v48 }
  0x99   : > { %618 = vmatpush2.bf16.msra.mxu0 %v583_v50  ;;  %v558_v50 = vpack.c.bf16 %v456_v42, %v450_v41  ;;  %v800_v57 = vld [vmem:[#allocation8 + $0x1e0] sm:$0xff]  ;;  %v789_v59 = vld [vmem:[#allocation8 + $0x188] sm:$0xff]  ;;  %v420_v20 = vld [vmem:[%s2259_s9 + $0x178] sm:$0xff] }
  0x9a   : > { %659 = vmatpush2.bf16.msra.mxu1 %v585_v51  ;;  %619 = vmatprep.subr.bf16.mxu0 %v578_v52  ;;  %v438_v51 = vld [vmem:[%s2259_s9 + $0x208] sm:$0xff]  ;;  %v1152_v58 = vpack.c.bf16 %v800_v57, %v796_v56  ;;  %v437_v61 = vld [vmem:[%s2259_s9 + $0x200] sm:$0xff]  ;;  %v419_v28 = vld [vmem:[%s2259_s9 + $0x170] sm:$0xff] }
  0x9b   : > { %660 = vmatprep.subr.bf16.mxu1 %v580_v62  ;;  %v797_v52 = vld [vmem:[#allocation8 + $0x1c8] sm:$0xff]  ;;  %v443_v62 = vld [vmem:[%s2259_s9 + $0x230] sm:$0xff]  ;;  %v552_v0 = vpack.c.bf16 %v444_v54, %v438_v51  ;;  %v788_v3 = vld [vmem:[#allocation8 + $0x180] sm:$0xff] }
  0x9c   : > { %v1153_v55 = vpack.c.bf16 %v801_v53, %v797_v52  ;;  %v793_v63 = vld [vmem:[#allocation8 + $0x1a8] sm:$0xff]  ;;  %v551_v9 = vpack.c.bf16 %v443_v62, %v437_v61  ;;  %v425_v10 = vld [vmem:[%s2259_s9 + $0x1a0] sm:$0xff]  ;;  %v408_v33 = vld [vmem:[%s2259_s9 + $0x118] sm:$0xff] }
  0x9d   : > { %620 = vmatpush2.bf16.msra.mxu0 %v577_v4  ;;  %v426_v1 = vld [vmem:[%s2259_s9 + $0x1a8] sm:$0xff]  ;;  %v1149_v2 = vpack.c.bf16 %v793_v63, %v789_v59  ;;  %v792_v4 = vld [vmem:[#allocation8 + $0x1a0] sm:$0xff]  ;;  %v407_v41 = vld [vmem:[%s2259_s9 + $0x110] sm:$0xff] }
  0x9e   : > { %661 = vmatpush2.bf16.msra.mxu1 %v579_v5  ;;  %621 = vmatprep.subr.bf16.mxu0 %v572_v8  ;;  %v432_v5 = vld [vmem:[%s2259_s9 + $0x1d8] sm:$0xff]  ;;  %v781_v6 = vld [vmem:[#allocation8 + $0x148] sm:$0xff]  ;;  %v1148_v8 = vpack.c.bf16 %v792_v4, %v788_v3  ;;  %v780_v14 = vld [vmem:[#allocation8 + $0x140] sm:$0xff] }
  0x9f   : > { %662 = vmatprep.subr.bf16.mxu1 %v574_v16  ;;  %v785_v7 = vld [vmem:[#allocation8 + $0x168] sm:$0xff]  ;;  %v546_v15 = vpack.c.bf16 %v432_v5, %v426_v1  ;;  %v431_v16 = vld [vmem:[%s2259_s9 + $0x1d0] sm:$0xff]  ;;  %v413_v23 = vld [vmem:[%s2259_s9 + $0x140] sm:$0xff] }
  0xa0   : > { %v1145_v11 = vpack.c.bf16 %v785_v7, %v781_v6  ;;  %v773_v17 = vld [vmem:[#allocation8 + $0x108] sm:$0xff]  ;;  %v545_v22 = vpack.c.bf16 %v431_v16, %v425_v10  ;;  %v539_v35 = vpack.c.bf16 %v419_v28, %v413_v23  ;;  %v768_v39 = vld [vmem:[#allocation8 + $0xe0] sm:$0xff]  ;;  %v396_v49 = vld [vmem:[%s2259_s9 + $0xb8] sm:$0xff] }
  0xa1   : > { %622 = vmatpush2.bf16.msra.mxu0 %v571_v24  ;;  %v777_v18 = vld [vmem:[#allocation8 + $0x128] sm:$0xff]  ;;  %v389_v52 = vld [vmem:[%s2259_s9 + $0x80] sm:$0xff]  ;;  %v395_v57 = vld [vmem:[%s2259_s9 + $0xb0] sm:$0xff] }
  0xa2   : > { %663 = vmatpush2.bf16.msra.mxu1 %v573_v25  ;;  %623 = vmatprep.subr.bf16.mxu0 %v566_v26  ;;  %v414_v19 = vld [vmem:[%s2259_s9 + $0x148] sm:$0xff]  ;;  %v1141_v24 = vpack.c.bf16 %v777_v18, %v773_v17  ;;  %v772_v25 = vld [vmem:[#allocation8 + $0x100] sm:$0xff]  ;;  %v384_v61 = vld [vmem:[%s2259_s9 + $0x58] sm:$0xff]  ;;  %v527_v63 = vpack.c.bf16 %v395_v57, %v389_v52 }
  0xa3   : > { %664 = vmatprep.subr.bf16.mxu1 %v568_v31  ;;  %v776_v26 = vld [vmem:[#allocation8 + $0x120] sm:$0xff]  ;;  %v540_v27 = vpack.c.bf16 %v420_v20, %v414_v19  ;;  %v765_v30 = vld [vmem:[#allocation8 + $0xc8] sm:$0xff]  ;;  %v383_v5 = vld [vmem:[%s2259_s9 + $0x50] sm:$0xff] }
  0xa4   : > { %v769_v31 = vld [vmem:[#allocation8 + $0xe8] sm:$0xff]  ;;  %v1140_v34 = vpack.c.bf16 %v776_v26, %v772_v25  ;;  %v756_v54 = vld [vmem:[#allocation8 + $0x80] sm:$0xff]  ;;  %v515_v18 = vld [vmem:[%s2259_s9 + $0x470] sm:$0xff] }
  0xa5   : > { %624 = vmatpush2.bf16.msra.mxu0 %v565_v36  ;;  %v402_v32 = vld [vmem:[%s2259_s9 + $0xe8] sm:$0xff]  ;;  %v401_v36 = vld [vmem:[%s2259_s9 + $0xe0] sm:$0xff] }
  0xa6   : > { %665 = vmatpush2.bf16.msra.mxu1 %v567_v37  ;;  %675 = vmatprep.subr.bf16.mxu0 %v564_v38  ;;  %v1137_v37 = vpack.c.bf16 %v769_v31, %v765_v30  ;;  %v764_v38 = vld [vmem:[#allocation8 + $0xc0] sm:$0xff]  ;;  %v534_v40 = vpack.c.bf16 %v408_v33, %v402_v32  ;;  %v757_v42 = vld [vmem:[#allocation8 + $0x88] sm:$0xff]  ;;  %v533_v51 = vpack.c.bf16 %v407_v41, %v401_v36  ;;  %v503_v31 = vld [vmem:[%s2259_s9 + $0x410] sm:$0xff] }
  0xa7   : > { %1341 = vmatprep.subr.bf16.mxu1 %v1153_v55  ;;  %v390_v48 = vld [vmem:[%s2259_s9 + $0x88] sm:$0xff]  ;;  %v760_v55 = vld [vmem:[#allocation8 + $0xa0] sm:$0xff] }
  0xa8   : > { %1752 = vmatmul.mubr.msk.bf16.vlgmr.msra.gmra.mxu0 %vm2410_vm3, %v2405_v43  ;;  %v528_v56 = vpack.c.bf16 %v396_v49, %v390_v48  ;;  %v753_v59 = vld [vmem:[#allocation8 + $0x68] sm:$0xff]  ;;  %v1132_v62 = vpack.c.bf16 %v760_v55, %v756_v54  ;;  %v752_v3 = vld [vmem:[#allocation8 + $0x60] sm:$0xff] }
  0xa9   : > { %1756 = vmatmul.mubr.msk.bf16.vlgmr.msra.gmra.mxu1 %vm2410_vm3, %v2405_v43  ;;  %676 = vmatpush1.bf16.msra.mxu0 %v563_v47  ;;  %v761_v47 = vld [vmem:[#allocation8 + $0xa8] sm:$0xff]  ;;  %v744_v16 = vld [vmem:[#allocation8 + $0x20] sm:$0xff] }
  0xaa   : > { %677 = vmatprep.subr.bf16.mxu0 %v558_v50  ;;  %1757 = vmatprep.mubr.msk.bf16.mxu0 %vm589_vm1, %v2376_v12  ;;  %v784_v12 = vld [vmem:[#allocation8 + $0x160] sm:$0xff]  ;;  %v1136_v50 = vpack.c.bf16 %v768_v39, %v764_v38  ;;  %v1133_v53 = vpack.c.bf16 %v761_v47, %v757_v42  ;;  %v741_v6 = vld [vmem:[#allocation8 + $0x8] sm:$0xff]  ;;  %v491_v47 = vld [vmem:[%s2259_s9 + $0x3b0] sm:$0xff] }
  0xab   : > { %1342 = vmatpush1.bf16.msra.mxu1 %v1152_v58  ;;  %v1144_v21 = vpack.c.bf16 %v784_v12, %v780_v14  ;;  %v749_v58 = vld [vmem:[#allocation8 + $0x48] sm:$0xff]  ;;  %v509_v14 = vld [vmem:[%s2259_s9 + $0x440] sm:$0xff] }
  0xac   : > { %1343 = vmatprep.subr.bf16.mxu1 %v1149_v2  ;;  %v1129_v1 = vpack.c.bf16 %v753_v59, %v749_v58  ;;  %v748_v2 = vld [vmem:[#allocation8 + $0x40] sm:$0xff]  ;;  %v745_v7 = vld [vmem:[#allocation8 + $0x28] sm:$0xff]  ;;  %v479_v59 = vld [vmem:[%s2259_s9 + $0x350] sm:$0xff] }
  0xad   : > { %678 = vmatpush1.bf16.msra.mxu0 %v557_v60  ;;  %v378_v60 = vld [vmem:[%s2259_s9 + $0x28] sm:$0xff]  ;;  %v1128_v10 = vpack.c.bf16 %v752_v3, %v748_v2  ;;  %v1125_v12 = vpack.c.bf16 %v745_v7, %v741_v6  ;;  %v497_v25 = vld [vmem:[%s2259_s9 + $0x3e0] sm:$0xff] }
  0xae   : > { %679 = vmatprep.subr.bf16.mxu0 %v552_v0  ;;  %v377_v0 = vld [vmem:[%s2259_s9 + $0x20] sm:$0xff]  ;;  %v522_v4 = vpack.c.bf16 %v384_v61, %v378_v60  ;;  %v861_v19 = vld [vmem:[#allocation8 + $0x3c8] sm:$0xff] }
  0xaf   : > { %1344 = vmatpush1.bf16.msra.mxu1 %v1148_v8  ;;  %v510_v8 = vld [vmem:[%s2259_s9 + $0x448] sm:$0xff]  ;;  %v864_v28 = vld [vmem:[#allocation8 + $0x3e0] sm:$0xff] }
  0xb0   : > { %1345 = vmatprep.subr.bf16.mxu1 %v1145_v11  ;;  %v521_v11 = vpack.c.bf16 %v383_v5, %v377_v0  ;;  %v865_v20 = vld [vmem:[#allocation8 + $0x3e8] sm:$0xff]  ;;  %v485_v38 = vld [vmem:[%s2259_s9 + $0x380] sm:$0xff] }
  0xb1   : > { %680 = vmatpush1.bf16.msra.mxu0 %v551_v9  ;;  %v516_v9 = vld [vmem:[%s2259_s9 + $0x478] sm:$0xff]  ;;  %v1185_v26 = vpack.c.bf16 %v865_v20, %v861_v19  ;;  %v853_v32 = vld [vmem:[#allocation8 + $0x388] sm:$0xff]  ;;  %v856_v41 = vld [vmem:[#allocation8 + $0x3a0] sm:$0xff] }
  0xb2   : > { %681 = vmatprep.subr.bf16.mxu0 %v546_v15  ;;  %v740_v15 = vld [vmem:[#allocation8] sm:$0xff]  ;;  %v588_v17 = vpack.c.bf16 %v516_v9, %v510_v8  ;;  %v857_v33 = vld [vmem:[#allocation8 + $0x3a8] sm:$0xff] }
  0xb3   : > { %1346 = vmatpush1.bf16.msra.mxu1 %v1144_v21  ;;  %v498_v21 = vld [vmem:[%s2259_s9 + $0x3e8] sm:$0xff]  ;;  %v1124_v23 = vpack.c.bf16 %v744_v16, %v740_v15  ;;  %v1181_v39 = vpack.c.bf16 %v857_v33, %v853_v32  ;;  %v473_v54 = vld [vmem:[%s2259_s9 + $0x320] sm:$0xff] }
  0xb4   : > { %1347 = vmatprep.subr.bf16.mxu1 %v1141_v24  ;;  %v587_v24 = vpack.c.bf16 %v515_v18, %v509_v14  ;;  %v845_v48 = vld [vmem:[#allocation8 + $0x348] sm:$0xff]  ;;  %v848_v57 = vld [vmem:[#allocation8 + $0x360] sm:$0xff] }
  0xb5   : > { %682 = vmatpush1.bf16.msra.mxu0 %v545_v22  ;;  %v504_v22 = vld [vmem:[%s2259_s9 + $0x418] sm:$0xff]  ;;  %v849_v49 = vld [vmem:[#allocation8 + $0x368] sm:$0xff]  ;;  %v924_v2 = vld [vmem:[#allocation8 + $0x5c0] sm:$0xff] }
  0xb6   : > { %683 = vmatprep.subr.bf16.mxu0 %v540_v27  ;;  %v860_v27 = vld [vmem:[#allocation8 + $0x3c0] sm:$0xff]  ;;  %v582_v30 = vpack.c.bf16 %v504_v22, %v498_v21  ;;  %v1177_v55 = vpack.c.bf16 %v849_v49, %v845_v48  ;;  %v837_v60 = vld [vmem:[#allocation8 + $0x308] sm:$0xff] }
  0xb7   : > { %1348 = vmatpush1.bf16.msra.mxu1 %v1140_v34  ;;  %v486_v34 = vld [vmem:[%s2259_s9 + $0x388] sm:$0xff]  ;;  %v1184_v36 = vpack.c.bf16 %v864_v28, %v860_v27  ;;  %v840_v5 = vld [vmem:[#allocation8 + $0x320] sm:$0xff] }
  0xb8   : > { %1349 = vmatprep.subr.bf16.mxu1 %v1137_v37  ;;  %v581_v37 = vpack.c.bf16 %v503_v31, %v497_v25  ;;  %v841_v61 = vld [vmem:[#allocation8 + $0x328] sm:$0xff]  ;;  %v928_v7 = vld [vmem:[#allocation8 + $0x5e0] sm:$0xff] }
  0xb9   : > { %684 = vmatpush1.bf16.msra.mxu0 %v539_v35  ;;  %v492_v35 = vld [vmem:[%s2259_s9 + $0x3b8] sm:$0xff]  ;;  %v1173_v3 = vpack.c.bf16 %v841_v61, %v837_v60  ;;  %v829_v8 = vld [vmem:[#allocation8 + $0x2c8] sm:$0xff]  ;;  %v916_v15 = vld [vmem:[#allocation8 + $0x580] sm:$0xff] }
  0xba   : > { %685 = vmatprep.subr.bf16.mxu0 %v534_v40  ;;  %v852_v40 = vld [vmem:[#allocation8 + $0x380] sm:$0xff]  ;;  %v576_v42 = vpack.c.bf16 %v492_v35, %v486_v34  ;;  %v833_v9 = vld [vmem:[#allocation8 + $0x2e8] sm:$0xff] }
  0xbb   : > { %1350 = vmatpush1.bf16.msra.mxu1 %v1136_v50  ;;  %v474_v50 = vld [vmem:[%s2259_s9 + $0x328] sm:$0xff]  ;;  %v1180_v52 = vpack.c.bf16 %v856_v41, %v852_v40  ;;  %v1169_v16 = vpack.c.bf16 %v833_v9, %v829_v8  ;;  %v832_v18 = vld [vmem:[#allocation8 + $0x2e0] sm:$0xff] }
  0xbc   : > { %1351 = vmatprep.subr.bf16.mxu1 %v1133_v53  ;;  %v575_v53 = vpack.c.bf16 %v491_v47, %v485_v38  ;;  %v920_v20 = vld [vmem:[#allocation8 + $0x5a0] sm:$0xff]  ;;  %v821_v21 = vld [vmem:[#allocation8 + $0x288] sm:$0xff] }
  0xbd   : > { %686 = vmatpush1.bf16.msra.mxu0 %v533_v51  ;;  %v480_v51 = vld [vmem:[%s2259_s9 + $0x358] sm:$0xff]  ;;  %v825_v22 = vld [vmem:[#allocation8 + $0x2a8] sm:$0xff]  ;;  %v908_v27 = vld [vmem:[#allocation8 + $0x540] sm:$0xff] }
  0xbe   : > { %687 = vmatprep.subr.bf16.mxu0 %v528_v56  ;;  %v844_v56 = vld [vmem:[#allocation8 + $0x340] sm:$0xff]  ;;  %v570_v58 = vpack.c.bf16 %v480_v51, %v474_v50  ;;  %v1165_v28 = vpack.c.bf16 %v825_v22, %v821_v21  ;;  %v813_v34 = vld [vmem:[#allocation8 + $0x248] sm:$0xff] }
  0xbf   : > { %1352 = vmatpush1.bf16.msra.mxu1 %v1132_v62  ;;  %v925_v62 = vld [vmem:[#allocation8 + $0x5c8] sm:$0xff]  ;;  %v1176_v0 = vpack.c.bf16 %v848_v57, %v844_v56  ;;  %v824_v31 = vld [vmem:[#allocation8 + $0x2a0] sm:$0xff] }
  0xc0   : > { %1353 = vmatprep.subr.bf16.mxu1 %v1129_v1  ;;  %v569_v1 = vpack.c.bf16 %v479_v59, %v473_v54  ;;  %v912_v33 = vld [vmem:[#allocation8 + $0x560] sm:$0xff]  ;;  %v817_v35 = vld [vmem:[#allocation8 + $0x268] sm:$0xff] }
  0xc1   : > { %688 = vmatpush1.bf16.msra.mxu0 %v527_v63  ;;  %v929_v63 = vld [vmem:[#allocation8 + $0x5e8] sm:$0xff]  ;;  %v1161_v44 = vpack.c.bf16 %v817_v35, %v813_v34  ;;  %v900_v40 = vld [vmem:[#allocation8 + $0x500] sm:$0xff] }
  0xc2   : > { %689 = vmatprep.subr.bf16.mxu0 %v522_v4  ;;  %v836_v4 = vld [vmem:[#allocation8 + $0x300] sm:$0xff]  ;;  %v1217_v6 = vpack.c.bf16 %v929_v63, %v925_v62  ;;  %v897_v47 = vld [vmem:[#allocation8 + $0x4e8] sm:$0xff] }
  0xc3   : > { %1354 = vmatpush1.bf16.msra.mxu1 %v1128_v10  ;;  %v917_v10 = vld [vmem:[#allocation8 + $0x588] sm:$0xff]  ;;  %v1172_v14 = vpack.c.bf16 %v840_v5, %v836_v4  ;;  %v904_v41 = vld [vmem:[#allocation8 + $0x520] sm:$0xff] }
  0xc4   : > { %1355 = vmatprep.subr.bf16.mxu1 %v1125_v12  ;;  %v1216_v12 = vpack.c.bf16 %v928_v7, %v924_v2  ;;  %v1204_v48 = vpack.c.bf16 %v904_v41, %v900_v40  ;;  %v892_v50 = vld [vmem:[#allocation8 + $0x4c0] sm:$0xff]  ;;  %v877_v60 = vld [vmem:[#allocation8 + $0x448] sm:$0xff] }
  0xc5   : > { %690 = vmatpush1.bf16.msra.mxu0 %v521_v11  ;;  %v921_v11 = vld [vmem:[#allocation8 + $0x5a8] sm:$0xff]  ;;  %v896_v51 = vld [vmem:[#allocation8 + $0x4e0] sm:$0xff] }
  0xc6   : > { %699 = vmatprep.subr.bf16.mxu0 %v588_v17  ;;  %v828_v17 = vld [vmem:[#allocation8 + $0x2c0] sm:$0xff]  ;;  %v1213_v19 = vpack.c.bf16 %v921_v11, %v917_v10  ;;  %v1200_v54 = vpack.c.bf16 %v896_v51, %v892_v50  ;;  %v881_v61 = vld [vmem:[#allocation8 + $0x468] sm:$0xff] }
  0xc7   : > { %1356 = vmatpush1.bf16.msra.mxu1 %v1124_v23  ;;  %v909_v23 = vld [vmem:[#allocation8 + $0x548] sm:$0xff]  ;;  %v1168_v25 = vpack.c.bf16 %v832_v18, %v828_v17  ;;  %v888_v57 = vld [vmem:[#allocation8 + $0x4a0] sm:$0xff] }
  0xc8   : > { %1357 = vmatprep.subr.bf16.mxu1 %v1185_v26  ;;  %v1212_v26 = vpack.c.bf16 %v920_v20, %v916_v15  ;;  %v816_v59 = vld [vmem:[#allocation8 + $0x260] sm:$0xff]  ;;  %v809_v2 = vld [vmem:[#allocation8 + $0x228] sm:$0xff] }
  0xc9   : > { %700 = vmatpush2.bf16.msra.mxu0 %v587_v24  ;;  %v913_v24 = vld [vmem:[#allocation8 + $0x568] sm:$0xff]  ;;  %v880_v4 = vld [vmem:[#allocation8 + $0x460] sm:$0xff] }
  0xca   : > { %701 = vmatprep.subr.bf16.mxu0 %v582_v30  ;;  %v820_v30 = vld [vmem:[#allocation8 + $0x280] sm:$0xff]  ;;  %v1209_v32 = vpack.c.bf16 %v913_v24, %v909_v23  ;;  %v869_v8 = vld [vmem:[#allocation8 + $0x408] sm:$0xff] }
  0xcb   : > { %1358 = vmatpush2.bf16.msra.mxu1 %v1184_v36  ;;  %v901_v36 = vld [vmem:[#allocation8 + $0x508] sm:$0xff]  ;;  %v1164_v38 = vpack.c.bf16 %v824_v31, %v820_v30  ;;  %v808_v7 = vld [vmem:[#allocation8 + $0x220] sm:$0xff] }
  0xcc   : > { %1359 = vmatprep.subr.bf16.mxu1 %v1181_v39  ;;  %v873_v9 = vld [vmem:[#allocation8 + $0x428] sm:$0xff]  ;;  %v872_v17 = vld [vmem:[#allocation8 + $0x420] sm:$0xff] }
  0xcd   : > { %702 = vmatpush2.bf16.msra.mxu0 %v581_v37  ;;  %v905_v37 = vld [vmem:[#allocation8 + $0x528] sm:$0xff]  ;;  %v1189_v15 = vpack.c.bf16 %v873_v9, %v869_v8  ;;  %v988_v23 = vld [vmem:[#allocation8 + $0x7c0] sm:$0xff] }
  0xce   : > { %703 = vmatprep.subr.bf16.mxu0 %v576_v42  ;;  %v1205_v39 = vpack.c.bf16 %v905_v37, %v901_v36  ;;  %v893_v42 = vld [vmem:[#allocation8 + $0x4c8] sm:$0xff]  ;;  %v992_v24 = vld [vmem:[#allocation8 + $0x7e0] sm:$0xff] }
  0xcf   : > { %1360 = vmatpush2.bf16.msra.mxu1 %v1180_v52  ;;  %v1201_v49 = vpack.c.bf16 %v897_v47, %v893_v42  ;;  %v885_v52 = vld [vmem:[#allocation8 + $0x488] sm:$0xff]  ;;  %v980_v30 = vld [vmem:[#allocation8 + $0x780] sm:$0xff] }
  0xd0   : > { %1361 = vmatprep.subr.bf16.mxu1 %v1177_v55  ;;  %v884_v55 = vld [vmem:[#allocation8 + $0x480] sm:$0xff]  ;;  %v993_v20 = vld [vmem:[#allocation8 + $0x7e8] sm:$0xff] }
  0xd1   : > { %704 = vmatpush2.bf16.msra.mxu0 %v575_v53  ;;  %v889_v53 = vld [vmem:[#allocation8 + $0x4a8] sm:$0xff]  ;;  %v1196_v63 = vpack.c.bf16 %v888_v57, %v884_v55  ;;  %v984_v31 = vld [vmem:[#allocation8 + $0x7a0] sm:$0xff] }
  0xd2   : > { %705 = vmatprep.subr.bf16.mxu0 %v570_v58  ;;  %v1197_v56 = vpack.c.bf16 %v889_v53, %v885_v52  ;;  %v812_v58 = vld [vmem:[#allocation8 + $0x240] sm:$0xff]  ;;  %v1244_v34 = vpack.c.bf16 %v984_v31, %v980_v30  ;;  %v957_v42 = vld [vmem:[#allocation8 + $0x6c8] sm:$0xff]  ;;  %v791_v31 = vld [vmem:[#allocation8 + $0x198] sm:$0xff] }
  0xd3   : > { %1362 = vmatpush2.bf16.msra.mxu1 %v1176_v0  ;;  %v1160_v62 = vpack.c.bf16 %v816_v59, %v812_v58  ;;  %v876_v0 = vld [vmem:[#allocation8 + $0x440] sm:$0xff]  ;;  %v961_v47 = vld [vmem:[#allocation8 + $0x6e8] sm:$0xff] }
  0xd4   : > { %1363 = vmatprep.subr.bf16.mxu1 %v1173_v3  ;;  %v1193_v3 = vpack.c.bf16 %v881_v61, %v877_v60  ;;  %v1192_v11 = vpack.c.bf16 %v880_v4, %v876_v0  ;;  %v972_v36 = vld [vmem:[#allocation8 + $0x740] sm:$0xff]  ;;  %v949_v52 = vld [vmem:[#allocation8 + $0x688] sm:$0xff] }
  0xd5   : > { %706 = vmatpush2.bf16.msra.mxu0 %v569_v1  ;;  %v805_v1 = vld [vmem:[#allocation8 + $0x208] sm:$0xff]  ;;  %v976_v37 = vld [vmem:[#allocation8 + $0x760] sm:$0xff] }
  0xd6   : > { %1382 = vmatprep.subr.bf16.mxu0 %v1217_v6  ;;  %v1157_v5 = vpack.c.bf16 %v809_v2, %v805_v1  ;;  %v804_v6 = vld [vmem:[#allocation8 + $0x200] sm:$0xff]  ;;  %v953_v53 = vld [vmem:[#allocation8 + $0x6a8] sm:$0xff] }
  0xd7   : > { %1364 = vmatpush2.bf16.msra.mxu1 %v1172_v14  ;;  %v1156_v10 = vpack.c.bf16 %v808_v7, %v804_v6  ;;  %v1053_v14 = vld [vmem:[#allocation8 + $0x9c8] sm:$0xff]  ;;  %v964_v40 = vld [vmem:[#allocation8 + $0x700] sm:$0xff]  ;;  %v1229_v55 = vpack.c.bf16 %v953_v53, %v949_v52  ;;  %v799_v6 = vld [vmem:[#allocation8 + $0x1d8] sm:$0xff] }
  0xd8   : > { %1760 = vmatmul.mubr.msk.bf16.vlgmr.msra.gmra.mxu0 %vm2410_vm3, %v2405_v43  ;;  %1365 = vmatprep.subr.bf16.mxu1 %v1169_v16  ;;  %v1208_v43 = vpack.c.bf16 %v912_v33, %v908_v27  ;;  %v868_v16 = vld [vmem:[#allocation8 + $0x400] sm:$0xff]  ;;  %v1248_v27 = vpack.c.bf16 %v992_v24, %v988_v23  ;;  %v977_v33 = vld [vmem:[#allocation8 + $0x768] sm:$0xff]  ;;  %v803_v7 = vld [vmem:[#allocation8 + $0x1f8] sm:$0xff] }
  0xd9   : > { %1383 = vmatpush1.bf16.msra.mxu0 %v1216_v12  ;;  %v1057_v12 = vld [vmem:[#allocation8 + $0x9e8] sm:$0xff]  ;;  %v1188_v21 = vpack.c.bf16 %v872_v17, %v868_v16  ;;  %v968_v41 = vld [vmem:[#allocation8 + $0x720] sm:$0xff]  ;;  %v1155_v9 = vpack.c.bf16 %v803_v7, %v799_v6  ;;  %v798_v24 = vld [vmem:[#allocation8 + $0x1d0] sm:$0xff] }
  0xda   : > { %1384 = vmatprep.subr.bf16.mxu0 %v1213_v19  ;;  %v1281_v18 = vpack.c.bf16 %v1057_v12, %v1053_v14  ;;  %v989_v19 = vld [vmem:[#allocation8 + $0x7c8] sm:$0xff]  ;;  %v956_v50 = vld [vmem:[#allocation8 + $0x6c0] sm:$0xff]  ;;  %v783_v52 = vld [vmem:[#allocation8 + $0x158] sm:$0xff] }
  0xdb   : > { %1366 = vmatpush2.bf16.msra.mxu1 %v1168_v25  ;;  %v1249_v22 = vpack.c.bf16 %v993_v20, %v989_v19  ;;  %v981_v25 = vld [vmem:[#allocation8 + $0x788] sm:$0xff]  ;;  %v960_v51 = vld [vmem:[#allocation8 + $0x6e0] sm:$0xff]  ;;  %v787_v53 = vld [vmem:[#allocation8 + $0x178] sm:$0xff] }
  0xdc   : > { %1367 = vmatprep.subr.bf16.mxu1 %v1165_v28  ;;  %v952_v57 = vld [vmem:[#allocation8 + $0x6a0] sm:$0xff]  ;;  %v941_v58 = vld [vmem:[#allocation8 + $0x648] sm:$0xff]  ;;  %v774_v7 = vld [vmem:[#allocation8 + $0x110] sm:$0xff] }
  0xdd   : > { %1385 = vmatpush1.bf16.msra.mxu0 %v1212_v26  ;;  %v985_v26 = vld [vmem:[#allocation8 + $0x7a8] sm:$0xff]  ;;  %v932_v4 = vld [vmem:[#allocation8 + $0x600] sm:$0xff] }
  0xde   : > { %1386 = vmatprep.subr.bf16.mxu0 %v1209_v32  ;;  %v1245_v28 = vpack.c.bf16 %v985_v26, %v981_v25  ;;  %v973_v32 = vld [vmem:[#allocation8 + $0x748] sm:$0xff]  ;;  %v1052_v20 = vld [vmem:[#allocation8 + $0x9c0] sm:$0xff]  ;;  %v802_v25 = vld [vmem:[#allocation8 + $0x1f0] sm:$0xff] }
  0xdf   : > { %1368 = vmatpush2.bf16.msra.mxu1 %v1164_v38  ;;  %v1241_v35 = vpack.c.bf16 %v977_v33, %v973_v32  ;;  %v965_v38 = vld [vmem:[#allocation8 + $0x708] sm:$0xff]  ;;  %v795_v32 = vld [vmem:[#allocation8 + $0x1b8] sm:$0xff]  ;;  %v1032_v6 = vld [vmem:[#allocation8 + $0x920] sm:$0xff] }
  0xe0   : > { %1369 = vmatprep.subr.bf16.mxu1 %v1161_v44  ;;  %v1240_v44 = vpack.c.bf16 %v976_v37, %v972_v36  ;;  %v945_v59 = vld [vmem:[#allocation8 + $0x668] sm:$0xff] }
  0xe1   : > { %1387 = vmatpush1.bf16.msra.mxu0 %v1208_v43  ;;  %v969_v43 = vld [vmem:[#allocation8 + $0x728] sm:$0xff]  ;;  %v1225_v61 = vpack.c.bf16 %v945_v59, %v941_v58  ;;  %v1040_v58 = vld [vmem:[#allocation8 + $0x960] sm:$0xff]  ;;  %v782_v59 = vld [vmem:[#allocation8 + $0x150] sm:$0xff] }
  0xe2   : > { %1388 = vmatprep.subr.bf16.mxu0 %v1205_v39  ;;  %v1237_v39 = vpack.c.bf16 %v969_v43, %v965_v38  ;;  %v933_v0 = vld [vmem:[#allocation8 + $0x608] sm:$0xff] }
  0xe3   : > { %1370 = vmatpush2.bf16.msra.mxu1 %v1160_v62  ;;  %v940_v62 = vld [vmem:[#allocation8 + $0x640] sm:$0xff]  ;;  %v937_v1 = vld [vmem:[#allocation8 + $0x628] sm:$0xff] }
  0xe4   : > { %1371 = vmatprep.subr.bf16.mxu1 %v1157_v5  ;;  %v936_v5 = vld [vmem:[#allocation8 + $0x620] sm:$0xff]  ;;  %v1045_v26 = vld [vmem:[#allocation8 + $0x988] sm:$0xff] }
  0xe5   : > { %1389 = vmatpush1.bf16.msra.mxu0 %v1204_v48  ;;  %v1236_v48 = vpack.c.bf16 %v968_v41, %v964_v40  ;;  %v1220_v8 = vpack.c.bf16 %v936_v5, %v932_v4  ;;  %v1049_v30 = vld [vmem:[#allocation8 + $0x9a8] sm:$0xff]  ;;  %v1048_v40 = vld [vmem:[#allocation8 + $0x9a0] sm:$0xff]  ;;  %v790_v41 = vld [vmem:[#allocation8 + $0x190] sm:$0xff] }
  0xe6   : > { %1390 = vmatprep.subr.bf16.mxu0 %v1201_v49  ;;  %v1233_v49 = vpack.c.bf16 %v961_v47, %v957_v42  ;;  %v1277_v47 = vpack.c.bf16 %v1049_v30, %v1045_v26  ;;  %v1028_v5 = vld [vmem:[#allocation8 + $0x900] sm:$0xff]  ;;  %v1017_v26 = vld [vmem:[#allocation8 + $0x8a8] sm:$0xff] }
  0xe7   : > { %1372 = vmatpush2.bf16.msra.mxu1 %v1156_v10 }
  0xe8   : > { %1423 = vmatprep.subr.bf16.mxu1 %v1281_v18 }
  0xe9   : > { %1391 = vmatpush1.bf16.msra.mxu0 %v1200_v54  ;;  %v1232_v54 = vpack.c.bf16 %v960_v51, %v956_v50  ;;  %v1037_v50 = vld [vmem:[#allocation8 + $0x948] sm:$0xff] }
  0xea   : > { %1392 = vmatprep.subr.bf16.mxu0 %v1197_v56  ;;  %v948_v56 = vld [vmem:[#allocation8 + $0x680] sm:$0xff]  ;;  %v1041_v51 = vld [vmem:[#allocation8 + $0x968] sm:$0xff] }
  0xeb   : > { %v1228_v60 = vpack.c.bf16 %v952_v57, %v948_v56  ;;  %v1273_v56 = vpack.c.bf16 %v1041_v51, %v1037_v50  ;;  %v1036_v57 = vld [vmem:[#allocation8 + $0x940] sm:$0xff] }
  0xec   : > { %v1004_v50 = vld [vmem:[#allocation8 + $0x840] sm:$0xff] }
  0xed   : > { %1393 = vmatpush1.bf16.msra.mxu0 %v1196_v63  ;;  %v944_v63 = vld [vmem:[#allocation8 + $0x660] sm:$0xff] }
  0xee   : > { %1394 = vmatprep.subr.bf16.mxu0 %v1193_v3  ;;  %v1224_v2 = vpack.c.bf16 %v944_v63, %v940_v62  ;;  %v1221_v3 = vpack.c.bf16 %v937_v1, %v933_v0  ;;  %v1029_v62 = vld [vmem:[#allocation8 + $0x908] sm:$0xff]  ;;  %v775_v0 = vld [vmem:[#allocation8 + $0x118] sm:$0xff]  ;;  %v1008_v51 = vld [vmem:[#allocation8 + $0x860] sm:$0xff] }
  0xef   : > { %v1033_v63 = vld [vmem:[#allocation8 + $0x928] sm:$0xff]  ;;  %v779_v1 = vld [vmem:[#allocation8 + $0x138] sm:$0xff] }
  0xf0   : > { %v1269_v4 = vpack.c.bf16 %v1033_v63, %v1029_v62  ;;  %v996_v62 = vld [vmem:[#allocation8 + $0x800] sm:$0xff] }
  0xf1   : > { %1395 = vmatpush1.bf16.msra.mxu0 %v1192_v11  ;;  %v1000_v63 = vld [vmem:[#allocation8 + $0x820] sm:$0xff] }
  0xf2   : > { %1396 = vmatprep.subr.bf16.mxu0 %v1189_v15 }
  0xf5   : > { %1397 = vmatpush1.bf16.msra.mxu0 %v1188_v21  ;;  %v1056_v21 = vld [vmem:[#allocation8 + $0x9e0] sm:$0xff] }
  0xf6   : > { %1398 = vmatprep.subr.bf16.mxu0 %v1249_v22  ;;  %v1280_v36 = vpack.c.bf16 %v1056_v21, %v1052_v20  ;;  %v1020_v20 = vld [vmem:[#allocation8 + $0x8c0] sm:$0xff] }
  0xf7   : > { %v1024_v21 = vld [vmem:[#allocation8 + $0x8e0] sm:$0xff] }
  0xf8   : > { %v1264_v30 = vpack.c.bf16 %v1024_v21, %v1020_v20  ;;  %v855_v20 = vld [vmem:[#allocation8 + $0x398] sm:$0xff] }
  0xf9   : > { %1399 = vmatpush2.bf16.msra.mxu0 %v1248_v27  ;;  %v859_v21 = vld [vmem:[#allocation8 + $0x3b8] sm:$0xff] }
  0xfa   : > { %1400 = vmatprep.subr.bf16.mxu0 %v1245_v28 }
  0xfd   : > { %1401 = vmatpush2.bf16.msra.mxu0 %v1244_v34 }
  0xfe   : > { %1402 = vmatprep.subr.bf16.mxu0 %v1241_v35 }
 0x101   : > { %1403 = vmatpush2.bf16.msra.mxu0 %v1240_v44  ;;  %v1154_v44 = vpack.c.bf16 %v802_v25, %v798_v24  ;;  %v770_v24 = vld [vmem:[#allocation8 + $0xf0] sm:$0xff]  ;;  %v1013_v25 = vld [vmem:[#allocation8 + $0x888] sm:$0xff] }
 0x102   : > { %1404 = vmatprep.subr.bf16.mxu0 %v1237_v39  ;;  %v1044_v39 = vld [vmem:[#allocation8 + $0x980] sm:$0xff] }
 0x105   : > { %1405 = vmatpush2.bf16.msra.mxu0 %v1236_v48  ;;  %v1151_v48 = vpack.c.bf16 %v795_v32, %v791_v31  ;;  %v1261_v32 = vpack.c.bf16 %v1017_v26, %v1013_v25  ;;  %v1108_v25 = vld [vmem:[#allocation8 + $0xb80] sm:$0xff] }
 0x106   : > { %1406 = vmatprep.subr.bf16.mxu0 %v1233_v49  ;;  %v794_v49 = vld [vmem:[#allocation8 + $0x1b0] sm:$0xff]  ;;  %v1112_v26 = vld [vmem:[#allocation8 + $0xba0] sm:$0xff] }
 0x109   : > { %1407 = vmatpush2.bf16.msra.mxu0 %v1232_v54  ;;  %v1276_v54 = vpack.c.bf16 %v1048_v40, %v1044_v39  ;;  %v1005_v39 = vld [vmem:[#allocation8 + $0x848] sm:$0xff] }
 0x10a   : > { %1408 = vmatprep.subr.bf16.mxu0 %v1229_v55  ;;  %v1150_v55 = vpack.c.bf16 %v794_v49, %v790_v41  ;;  %v1009_v40 = vld [vmem:[#allocation8 + $0x868] sm:$0xff]  ;;  %v751_v41 = vld [vmem:[#allocation8 + $0x58] sm:$0xff] }
 0x10b   : > { %v1257_v49 = vpack.c.bf16 %v1009_v40, %v1005_v39  ;;  %v1100_v39 = vld [vmem:[#allocation8 + $0xb40] sm:$0xff] }
 0x10c   : > { %v1104_v40 = vld [vmem:[#allocation8 + $0xb60] sm:$0xff] }
 0x10d   : > { %1409 = vmatpush2.bf16.msra.mxu0 %v1228_v60  ;;  %v1147_v60 = vpack.c.bf16 %v787_v53, %v783_v52  ;;  %v750_v52 = vld [vmem:[#allocation8 + $0x50] sm:$0xff] }
 0x10e   : > { %1410 = vmatprep.subr.bf16.mxu0 %v1225_v61  ;;  %v786_v61 = vld [vmem:[#allocation8 + $0x170] sm:$0xff] }
 0x111   : > { %1411 = vmatpush2.bf16.msra.mxu0 %v1224_v2  ;;  %v1272_v2 = vpack.c.bf16 %v1040_v58, %v1036_v57  ;;  %v743_v57 = vld [vmem:[#allocation8 + $0x18] sm:$0xff] }
 0x112   : > { %1412 = vmatprep.subr.bf16.mxu0 %v1221_v3  ;;  %v1146_v3 = vpack.c.bf16 %v786_v61, %v782_v59  ;;  %v747_v58 = vld [vmem:[#allocation8 + $0x38] sm:$0xff]  ;;  %v1256_v59 = vpack.c.bf16 %v1008_v51, %v1004_v50 }
 0x113   : > { %v839_v50 = vld [vmem:[#allocation8 + $0x318] sm:$0xff] }
 0x114   : > { %v843_v51 = vld [vmem:[#allocation8 + $0x338] sm:$0xff] }
 0x115   : > { %1413 = vmatpush2.bf16.msra.mxu0 %v1220_v8  ;;  %v1143_v8 = vpack.c.bf16 %v779_v1, %v775_v0  ;;  %v742_v0 = vld [vmem:[#allocation8 + $0x10] sm:$0xff]  ;;  %v1127_v1 = vpack.c.bf16 %v747_v58, %v743_v57  ;;  %v1175_v58 = vpack.c.bf16 %v843_v51, %v839_v50  ;;  %v811_v50 = vld [vmem:[#allocation8 + $0x238] sm:$0xff] }
 0x116   : > { %1464 = vmatprep.subr.bf16.mxu0 %v1155_v9  ;;  %v778_v9 = vld [vmem:[#allocation8 + $0x130] sm:$0xff] }
 0x117   : > { %v838_v57 = vld [vmem:[#allocation8 + $0x310] sm:$0xff] }
 0x121   : > { %v723_v10 = vpop.xlane.xlu0 %722 }
 0x122   : > { %v2467_v11 = vmul.f32 0.083333336, %v723_v10  ;;  %v1021_v10 = vld [vmem:[#allocation8 + $0x8c8] sm:$0xff] }
 0x124   : > { %v726_v14 = vmax.f32 %v2467_v11, 1.0  ;;  %vm1316_vm4 = vcmp.gt.f32.partialorder %v2467_v11, 0.0 }
 0x126   : > { %1864 = vrcp.f32 %v726_v14  ;;  %v1025_v14 = vld [vmem:[#allocation8 + $0x8e8] sm:$0xff] }
 0x133   : > { %v2470_v12 = vpop.eup %1864 }
 0x168   : > { %v627_v15 = vpop.f32.mrf.mxu0 }
 0x169   : > { %v668_v16 = vpop.f32.mrf.mxu1  ;;  %v728_v17 = vmul.f32 %v2470_v12, %v627_v15  ;;  %v767_v15 = vld [vmem:[#allocation8 + $0xd8] sm:$0xff] }
 0x16a   : > { %v730_v18 = vmul.f32 %v2470_v12, %v668_v16  ;;  %v629_v19 = vpop.f32.mrf.mxu0  ;;  %v771_v16 = vld [vmem:[#allocation8 + $0xf8] sm:$0xff] }
 0x16b   : > { %v729_v22 = vmul.f32 %v2470_v12, %v629_v19  ;;  %v670_v23 = vpop.f32.mrf.mxu1  ;;  %v2478_v37 = vpack.c.bf16 %v728_v17, %v728_v17  ;;  %v1268_v17 = vpack.c.bf16 %v1032_v6, %v1028_v5  ;;  %v1265_v19 = vpack.c.bf16 %v1025_v14, %v1021_v10  ;;  %v863_v5 = vld [vmem:[#allocation8 + $0x3d8] sm:$0xff]  ;;  %v1116_v10 = vld [vmem:[#allocation8 + $0xbc0] sm:$0xff] }
 0x16c   : > { %v731_v27 = vmul.f32 %v2470_v12, %v670_v23  ;;  %v631_v28 = vpop.f32.mrf.mxu0  ;;  %v2476_v33 = vpack.c.bf16 %v730_v18, %v730_v18  ;;  %v1142_v18 = vpack.c.bf16 %v778_v9, %v774_v7  ;;  %v1139_v23 = vpack.c.bf16 %v771_v16, %v767_v15  ;;  %v867_v6 = vld [vmem:[#allocation8 + $0x3f8] sm:$0xff]  ;;  %v1120_v14 = vld [vmem:[#allocation8 + $0xbe0] sm:$0xff]  ;;  %v862_v15 = vld [vmem:[#allocation8 + $0x3d0] sm:$0xff] }
 0x16d   : > { %v735_v34 = vpack.c.bf16 %v729_v22, %v729_v22  ;;  %v672_v35 = vpop.f32.mrf.mxu1  ;;  %v766_v22 = vld [vmem:[#allocation8 + $0xd0] sm:$0xff]  ;;  %v763_v28 = vld [vmem:[#allocation8 + $0xb8] sm:$0xff]  ;;  %v1252_v7 = vpack.c.bf16 %v1000_v63, %v996_v62  ;;  %v1187_v16 = vpack.c.bf16 %v867_v6, %v863_v5  ;;  %v1084_v5 = vld [vmem:[#allocation8 + $0xac0] sm:$0xff] }
 0x16e   : > { %v2480_v38 = vpack.c.bf16 %v731_v27, %v731_v27  ;;  %v632_v43 = vpop.f32.mrf.mxu0  ;;  %v759_v27 = vld [vmem:[#allocation8 + $0x98] sm:$0xff]  ;;  %v1138_v31 = vpack.c.bf16 %v770_v24, %v766_v22  ;;  %v1016_v35 = vld [vmem:[#allocation8 + $0x8a0] sm:$0xff]  ;;  %v1312_v22 = vpack.c.bf16 %v1120_v14, %v1116_v10  ;;  %v834_v10 = vld [vmem:[#allocation8 + $0x2f0] sm:$0xff] }
 0x16f   : > { %v673_v42 = vpop.f32.mrf.mxu1  ;;  %1373 = vmatprep.mubr.bf16.mxu1 %v735_v34  ;;  %v1135_v43 = vpack.c.bf16 %v763_v28, %v759_v27  ;;  %v854_v27 = vld [vmem:[#allocation8 + $0x390] sm:$0xff]  ;;  %v1183_v28 = vpack.c.bf16 %v859_v21, %v855_v20  ;;  %v831_v63 = vld [vmem:[#allocation8 + $0x2d8] sm:$0xff]  ;;  %v1088_v6 = vld [vmem:[#allocation8 + $0xae0] sm:$0xff] }
 0x170   : > { %1414 = vmatprep.mubr.bf16.mxu0 %v2480_v38  ;;  %1374 = vmatmul.mubr.bf16.vlgmr.msra.gmra.mxu1 %v2478_v37  ;;  %v755_v42 = vld [vmem:[#allocation8 + $0x78] sm:$0xff]  ;;  %v1077_v14 = vld [vmem:[#allocation8 + $0xa88] sm:$0xff]  ;;  %v1296_v20 = vpack.c.bf16 %v1088_v6, %v1084_v5  ;;  %v930_v5 = vld [vmem:[#allocation8 + $0x5f0] sm:$0xff] }
 0x171   : > { %1415 = vmatmul.mubr.bf16.vlgmr.msra.gmra.mxu0 %v2476_v33  ;;  %1424 = vmatpush1.bf16.msra.mxu1 %v1280_v36  ;;  %v758_v36 = vld [vmem:[#allocation8 + $0x90] sm:$0xff]  ;;  %v1131_v53 = vpack.c.bf16 %v755_v42, %v751_v41 }
 0x172   : > { %1465 = vmatpush1.bf16.msra.mxu0 %v1154_v44  ;;  %1496 = vmatprep.mubr.bf16.mxu0 %v735_v34  ;;  %v1012_v34 = vld [vmem:[#allocation8 + $0x880] sm:$0xff]  ;;  %v762_v44 = vld [vmem:[#allocation8 + $0xb0] sm:$0xff] }
 0x173   : > { %1425 = vmatprep.subr.bf16.mxu1 %v1277_v47  ;;  %1466 = vmatprep.subr.bf16.mxu0 %v1151_v48  ;;  %v1260_v47 = vpack.c.bf16 %v1016_v35, %v1012_v34  ;;  %v1134_v48 = vpack.c.bf16 %v762_v44, %v758_v36  ;;  %v847_v34 = vld [vmem:[#allocation8 + $0x358] sm:$0xff]  ;;  %v1308_v36 = vpack.c.bf16 %v1112_v26, %v1108_v25  ;;  %v846_v41 = vld [vmem:[#allocation8 + $0x350] sm:$0xff] }
 0x174   : > { %v851_v35 = vld [vmem:[#allocation8 + $0x378] sm:$0xff]  ;;  %v822_v25 = vld [vmem:[#allocation8 + $0x290] sm:$0xff] }
 0x175   : > { %1426 = vmatpush1.bf16.msra.mxu1 %v1276_v54  ;;  %v754_v54 = vld [vmem:[#allocation8 + $0x70] sm:$0xff]  ;;  %v1179_v42 = vpack.c.bf16 %v851_v35, %v847_v34  ;;  %v819_v34 = vld [vmem:[#allocation8 + $0x278] sm:$0xff] }
 0x176   : > { %1467 = vmatpush1.bf16.msra.mxu0 %v1150_v55  ;;  %1427 = vmatprep.subr.bf16.mxu1 %v1273_v56  ;;  %v997_v55 = vld [vmem:[#allocation8 + $0x808] sm:$0xff] }
 0x177   : > { %1468 = vmatprep.subr.bf16.mxu0 %v1147_v60  ;;  %v1001_v56 = vld [vmem:[#allocation8 + $0x828] sm:$0xff]  ;;  %v1130_v60 = vpack.c.bf16 %v754_v54, %v750_v52  ;;  %v1304_v52 = vpack.c.bf16 %v1104_v40, %v1100_v39  ;;  %v1072_v39 = vld [vmem:[#allocation8 + $0xa60] sm:$0xff]  ;;  %v814_v40 = vld [vmem:[#allocation8 + $0x250] sm:$0xff] }
 0x178   : > { %v1253_v61 = vpack.c.bf16 %v1001_v56, %v997_v55  ;;  %v1092_v55 = vld [vmem:[#allocation8 + $0xb00] sm:$0xff] }
 0x179   : > { %1428 = vmatpush1.bf16.msra.mxu1 %v1272_v2  ;;  %v746_v2 = vld [vmem:[#allocation8 + $0x30] sm:$0xff]  ;;  %v1096_v56 = vld [vmem:[#allocation8 + $0xb20] sm:$0xff] }
 0x17a   : > { %1469 = vmatpush1.bf16.msra.mxu0 %v1146_v3  ;;  %1429 = vmatprep.subr.bf16.mxu1 %v1269_v4  ;;  %v1117_v3 = vld [vmem:[#allocation8 + $0xbc8] sm:$0xff] }
 0x17b   : > { %1470 = vmatprep.subr.bf16.mxu0 %v1143_v8  ;;  %v1121_v4 = vld [vmem:[#allocation8 + $0xbe8] sm:$0xff]  ;;  %v1126_v8 = vpack.c.bf16 %v746_v2, %v742_v0  ;;  %v835_v0 = vld [vmem:[#allocation8 + $0x2f8] sm:$0xff] }
 0x17c   : > { %v1313_v9 = vpack.c.bf16 %v1121_v4, %v1117_v3 }
 0x17d   : > { %1430 = vmatpush1.bf16.msra.mxu1 %v1268_v17  ;;  %v866_v17 = vld [vmem:[#allocation8 + $0x3f0] sm:$0xff] }
 0x17e   : > { %1471 = vmatpush1.bf16.msra.mxu0 %v1142_v18  ;;  %1431 = vmatprep.subr.bf16.mxu1 %v1265_v19  ;;  %v1109_v18 = vld [vmem:[#allocation8 + $0xb88] sm:$0xff] }
 0x17f   : > { %1472 = vmatprep.subr.bf16.mxu0 %v1139_v23  ;;  %v1113_v19 = vld [vmem:[#allocation8 + $0xba8] sm:$0xff]  ;;  %v1186_v23 = vpack.c.bf16 %v866_v17, %v862_v15  ;;  %v827_v17 = vld [vmem:[#allocation8 + $0x2b8] sm:$0xff] }
 0x180   : > { %v1309_v24 = vpack.c.bf16 %v1113_v19, %v1109_v18  ;;  %v1081_v15 = vld [vmem:[#allocation8 + $0xaa8] sm:$0xff] }
 0x181   : > { %1432 = vmatpush1.bf16.msra.mxu1 %v1264_v30  ;;  %v858_v30 = vld [vmem:[#allocation8 + $0x3b0] sm:$0xff] }
 0x182   : > { %1473 = vmatpush1.bf16.msra.mxu0 %v1138_v31  ;;  %1433 = vmatprep.subr.bf16.mxu1 %v1261_v32  ;;  %v1101_v31 = vld [vmem:[#allocation8 + $0xb48] sm:$0xff] }
 0x183   : > { %1474 = vmatprep.subr.bf16.mxu0 %v1135_v43  ;;  %v1105_v32 = vld [vmem:[#allocation8 + $0xb68] sm:$0xff]  ;;  %v1182_v43 = vpack.c.bf16 %v858_v30, %v854_v27 }
 0x184   : > { %v1305_v44 = vpack.c.bf16 %v1105_v32, %v1101_v31  ;;  %v1069_v30 = vld [vmem:[#allocation8 + $0xa48] sm:$0xff]  ;;  %v815_v32 = vld [vmem:[#allocation8 + $0x258] sm:$0xff] }
 0x185   : > { %1434 = vmatpush1.bf16.msra.mxu1 %v1260_v47  ;;  %v850_v47 = vld [vmem:[#allocation8 + $0x370] sm:$0xff]  ;;  %v1073_v31 = vld [vmem:[#allocation8 + $0xa68] sm:$0xff] }
 0x186   : > { %1475 = vmatpush1.bf16.msra.mxu0 %v1134_v48  ;;  %1435 = vmatprep.subr.bf16.mxu1 %v1257_v49  ;;  %v1093_v48 = vld [vmem:[#allocation8 + $0xb08] sm:$0xff] }
 0x187   : > { %1476 = vmatprep.subr.bf16.mxu0 %v1131_v53  ;;  %v1097_v49 = vld [vmem:[#allocation8 + $0xb28] sm:$0xff]  ;;  %v1178_v53 = vpack.c.bf16 %v850_v47, %v846_v41  ;;  %v1163_v41 = vpack.c.bf16 %v819_v34, %v815_v32  ;;  %v910_v32 = vld [vmem:[#allocation8 + $0x550] sm:$0xff] }
 0x188   : > { %v1301_v54 = vpack.c.bf16 %v1097_v49, %v1093_v48  ;;  %v1061_v47 = vld [vmem:[#allocation8 + $0xa08] sm:$0xff]  ;;  %v807_v49 = vld [vmem:[#allocation8 + $0x218] sm:$0xff]  ;;  %v914_v34 = vld [vmem:[#allocation8 + $0x570] sm:$0xff] }
 0x189   : > { %1436 = vmatpush1.bf16.msra.mxu1 %v1256_v59  ;;  %v842_v59 = vld [vmem:[#allocation8 + $0x330] sm:$0xff]  ;;  %v1065_v48 = vld [vmem:[#allocation8 + $0xa28] sm:$0xff] }
 0x18a   : > { %1477 = vmatpush1.bf16.msra.mxu0 %v1130_v60  ;;  %1437 = vmatprep.subr.bf16.mxu1 %v1253_v61  ;;  %v1085_v60 = vld [vmem:[#allocation8 + $0xac8] sm:$0xff]  ;;  %v1174_v3 = vpack.c.bf16 %v842_v59, %v838_v57  ;;  %v1159_v57 = vpack.c.bf16 %v811_v50, %v807_v49  ;;  %v927_v59 = vld [vmem:[#allocation8 + $0x5d8] sm:$0xff]  ;;  %v1030_v49 = vld [vmem:[#allocation8 + $0x910] sm:$0xff] }
 0x18b   : > { %1478 = vmatprep.subr.bf16.mxu0 %v1127_v1  ;;  %v1089_v61 = vld [vmem:[#allocation8 + $0xae8] sm:$0xff]  ;;  %v1300_v1 = vpack.c.bf16 %v1096_v56, %v1092_v55  ;;  %v1064_v55 = vld [vmem:[#allocation8 + $0xa20] sm:$0xff]  ;;  %v806_v56 = vld [vmem:[#allocation8 + $0x210] sm:$0xff] }
 0x18c   : > { %v1297_v4 = vpack.c.bf16 %v1089_v61, %v1085_v60  ;;  %v931_v60 = vld [vmem:[#allocation8 + $0x5f8] sm:$0xff] }
 0x18d   : > { %1438 = vmatpush1.bf16.msra.mxu1 %v1252_v7  ;;  %v830_v7 = vld [vmem:[#allocation8 + $0x2d0] sm:$0xff]  ;;  %v1055_v61 = vld [vmem:[#allocation8 + $0x9d8] sm:$0xff] }
 0x18e   : > { %1479 = vmatpush1.bf16.msra.mxu0 %v1126_v8  ;;  %1439 = vmatprep.subr.bf16.mxu1 %v1313_v9  ;;  %v1171_v9 = vpack.c.bf16 %v835_v0, %v831_v63  ;;  %v1170_v21 = vpack.c.bf16 %v834_v10, %v830_v7  ;;  %v1059_v63 = vld [vmem:[#allocation8 + $0x9f8] sm:$0xff]  ;;  %v1054_v7 = vld [vmem:[#allocation8 + $0x9d0] sm:$0xff] }
 0x18f   : > { %1480 = vmatprep.subr.bf16.mxu0 %v1187_v16  ;;  %v823_v16 = vld [vmem:[#allocation8 + $0x298] sm:$0xff]  ;;  %v1283_v6 = vpack.c.bf16 %v1059_v63, %v1055_v61  ;;  %v1026_v63 = vld [vmem:[#allocation8 + $0x8f0] sm:$0xff] }
 0x190   : > { %v1167_v27 = vpack.c.bf16 %v827_v17, %v823_v16  ;;  %v923_v10 = vld [vmem:[#allocation8 + $0x5b8] sm:$0xff] }
 0x191   : > { %1440 = vmatpush2.bf16.msra.mxu1 %v1312_v22  ;;  %v1293_v22 = vpack.c.bf16 %v1081_v15, %v1077_v14  ;;  %v1047_v15 = vld [vmem:[#allocation8 + $0x998] sm:$0xff] }
 0x192   : > { %1481 = vmatpush2.bf16.msra.mxu0 %v1186_v23  ;;  %1441 = vmatprep.subr.bf16.mxu1 %v1309_v24  ;;  %v1076_v23 = vld [vmem:[#allocation8 + $0xa80] sm:$0xff]  ;;  %v1051_v16 = vld [vmem:[#allocation8 + $0x9b8] sm:$0xff] }
 0x193   : > { %1482 = vmatprep.subr.bf16.mxu0 %v1183_v28  ;;  %v1080_v24 = vld [vmem:[#allocation8 + $0xaa0] sm:$0xff]  ;;  %v826_v28 = vld [vmem:[#allocation8 + $0x2b0] sm:$0xff] }
 0x194   : > { %v1292_v35 = vpack.c.bf16 %v1080_v24, %v1076_v23  ;;  %v911_v23 = vld [vmem:[#allocation8 + $0x558] sm:$0xff] }
 0x195   : > { %1442 = vmatpush2.bf16.msra.mxu1 %v1308_v36  ;;  %v1166_v36 = vpack.c.bf16 %v826_v28, %v822_v25  ;;  %v915_v24 = vld [vmem:[#allocation8 + $0x578] sm:$0xff]  ;;  %v1279_v25 = vpack.c.bf16 %v1051_v16, %v1047_v15 }
 0x196   : > { %1483 = vmatpush2.bf16.msra.mxu0 %v1182_v43  ;;  %1443 = vmatprep.subr.bf16.mxu1 %v1305_v44  ;;  %v1289_v43 = vpack.c.bf16 %v1073_v31, %v1069_v30  ;;  %v1068_v44 = vld [vmem:[#allocation8 + $0xa40] sm:$0xff]  ;;  %v1211_v31 = vpack.c.bf16 %v915_v24, %v911_v23  ;;  %v879_v15 = vld [vmem:[#allocation8 + $0x458] sm:$0xff]  ;;  %v882_v23 = vld [vmem:[#allocation8 + $0x470] sm:$0xff] }
 0x197   : > { %1484 = vmatprep.subr.bf16.mxu0 %v1179_v42  ;;  %v818_v42 = vld [vmem:[#allocation8 + $0x270] sm:$0xff]  ;;  %v1288_v51 = vpack.c.bf16 %v1072_v39, %v1068_v44  ;;  %v903_v44 = vld [vmem:[#allocation8 + $0x518] sm:$0xff] }
 0x198   : > { %v2485_v62 = vpop.f32.mrf.mxu0  ;;  %v907_v39 = vld [vmem:[#allocation8 + $0x538] sm:$0xff]  ;;  %v1006_v24 = vld [vmem:[#allocation8 + $0x850] sm:$0xff] }
 0x199   : > { %1444 = vmatpush2.bf16.msra.mxu1 %v1304_v52  ;;  %v1162_v52 = vpack.c.bf16 %v818_v42, %v814_v40  ;;  %v1031_v40 = vld [vmem:[#allocation8 + $0x918] sm:$0xff]  ;;  %v1207_v42 = vpack.c.bf16 %v907_v39, %v903_v44  ;;  %v998_v44 = vld [vmem:[#allocation8 + $0x810] sm:$0xff] }
 0x19a   : > { %1485 = vmatpush2.bf16.msra.mxu0 %v1178_v53  ;;  %v711_v2 = vpop.f32.mrf.mxu0  ;;  %1445 = vmatprep.subr.bf16.mxu1 %v1301_v54  ;;  %v1285_v53 = vpack.c.bf16 %v1065_v48, %v1061_v47  ;;  %v1060_v54 = vld [vmem:[#allocation8 + $0xa00] sm:$0xff]  ;;  %v902_v47 = vld [vmem:[#allocation8 + $0x510] sm:$0xff]  ;;  %v883_v16 = vld [vmem:[#allocation8 + $0x478] sm:$0xff] }
 0x19b   : > { %v733_v8 = vmul.f32 %v2470_v12, %v711_v2  ;;  %1486 = vmatprep.subr.bf16.mxu0 %v1175_v58  ;;  %v810_v58 = vld [vmem:[#allocation8 + $0x230] sm:$0xff]  ;;  %v1284_v0 = vpack.c.bf16 %v1064_v55, %v1060_v54  ;;  %v1027_v54 = vld [vmem:[#allocation8 + $0x8f8] sm:$0xff] }
 0x19c   : > { %v713_v18 = vpop.f32.mrf.mxu0  ;;  %v1158_v2 = vpack.c.bf16 %v810_v58, %v806_v56  ;;  %v906_v48 = vld [vmem:[#allocation8 + $0x530] sm:$0xff] }
 0x19d   : > { %v2488_v19 = vpack.c.bf16 %v733_v8, %v733_v8  ;;  %1446 = vmatpush2.bf16.msra.mxu1 %v1300_v1  ;;  %v732_v1 = vmul.f32 %v2470_v12, %v2485_v62  ;;  %v1058_v8 = vld [vmem:[#allocation8 + $0x9f0] sm:$0xff]  ;;  %v1206_v55 = vpack.c.bf16 %v906_v48, %v902_v47 }
 0x19e   : > { %1487 = vmatpush2.bf16.msra.mxu0 %v1174_v3  ;;  %1447 = vmatprep.subr.bf16.mxu1 %v1297_v4  ;;  %v714_v26 = vpop.f32.mrf.mxu0  ;;  %v1219_v3 = vpack.c.bf16 %v931_v60, %v927_v59  ;;  %v926_v4 = vld [vmem:[#allocation8 + $0x5d0] sm:$0xff]  ;;  %v1282_v12 = vpack.c.bf16 %v1058_v8, %v1054_v7 }
 0x19f   : > { %1455 = vmatprep.mubr.bf16.mxu1 %v2488_v19  ;;  %1488 = vmatprep.subr.bf16.mxu0 %v1171_v9  ;;  %v919_v9 = vld [vmem:[#allocation8 + $0x598] sm:$0xff]  ;;  %v1218_v14 = vpack.c.bf16 %v930_v5, %v926_v4  ;;  %v2493_v17 = vpack.c.bf16 %v732_v1, %v732_v1  ;;  %v918_v62 = vld [vmem:[#allocation8 + $0x590] sm:$0xff] }
 0x1a0   : > { %v922_v18 = vld [vmem:[#allocation8 + $0x5b0] sm:$0xff]  ;;  %v1039_v26 = vld [vmem:[#allocation8 + $0x958] sm:$0xff] }
 0x1a1   : > { %1448 = vmatpush2.bf16.msra.mxu1 %v1296_v20  ;;  %v1046_v20 = vld [vmem:[#allocation8 + $0x990] sm:$0xff]  ;;  %v1214_v28 = vpack.c.bf16 %v922_v18, %v918_v62  ;;  %v891_v1 = vld [vmem:[#allocation8 + $0x4b8] sm:$0xff] }
 0x1a2   : > { %1489 = vmatpush2.bf16.msra.mxu0 %v1170_v21  ;;  %1449 = vmatprep.subr.bf16.mxu1 %v1293_v22  ;;  %v1215_v21 = vpack.c.bf16 %v923_v10, %v919_v9  ;;  %v1050_v22 = vld [vmem:[#allocation8 + $0x9b0] sm:$0xff]  ;;  %v1011_v62 = vld [vmem:[#allocation8 + $0x878] sm:$0xff] }
 0x1a3   : > { %1490 = vmatprep.subr.bf16.mxu0 %v1167_v27  ;;  %v1043_v27 = vld [vmem:[#allocation8 + $0x978] sm:$0xff]  ;;  %v1278_v30 = vpack.c.bf16 %v1050_v22, %v1046_v20  ;;  %v894_v58 = vld [vmem:[#allocation8 + $0x4d0] sm:$0xff] }
 0x1a4   : > { %v898_v59 = vld [vmem:[#allocation8 + $0x4f0] sm:$0xff] }
 0x1a5   : > { %1450 = vmatpush2.bf16.msra.mxu1 %v1292_v35  ;;  %v1038_v35 = vld [vmem:[#allocation8 + $0x950] sm:$0xff]  ;;  %v1202_v4 = vpack.c.bf16 %v898_v59, %v894_v58 }
 0x1a6   : > { %1491 = vmatpush2.bf16.msra.mxu0 %v1166_v36  ;;  %1451 = vmatprep.subr.bf16.mxu1 %v1289_v43  ;;  %v1275_v36 = vpack.c.bf16 %v1043_v27, %v1039_v26  ;;  %v1042_v43 = vld [vmem:[#allocation8 + $0x970] sm:$0xff]  ;;  %v871_v27 = vld [vmem:[#allocation8 + $0x418] sm:$0xff] }
 0x1a7   : > { %1492 = vmatprep.subr.bf16.mxu0 %v1163_v41  ;;  %v1210_v41 = vpack.c.bf16 %v914_v34, %v910_v32  ;;  %v1022_v60 = vld [vmem:[#allocation8 + $0x8d0] sm:$0xff] }
 0x1a8   : > { %v1266_v5 = vpack.c.bf16 %v1026_v63, %v1022_v60  ;;  %v886_v7 = vld [vmem:[#allocation8 + $0x490] sm:$0xff] }
 0x1a9   : > { %1452 = vmatpush2.bf16.msra.mxu1 %v1288_v51  ;;  %v895_v51 = vld [vmem:[#allocation8 + $0x4d8] sm:$0xff]  ;;  %v890_v8 = vld [vmem:[#allocation8 + $0x4b0] sm:$0xff] }
 0x1aa   : > { %1493 = vmatpush2.bf16.msra.mxu0 %v1162_v52  ;;  %1453 = vmatprep.subr.bf16.mxu1 %v1285_v53  ;;  %v899_v52 = vld [vmem:[#allocation8 + $0x4f8] sm:$0xff]  ;;  %v1014_v9 = vld [vmem:[#allocation8 + $0x890] sm:$0xff]  ;;  %v1198_v18 = vpack.c.bf16 %v890_v8, %v886_v7 }
 0x1ab   : > { %1494 = vmatprep.subr.bf16.mxu0 %v1159_v57  ;;  %v1023_v53 = vld [vmem:[#allocation8 + $0x8d8] sm:$0xff]  ;;  %v1203_v57 = vpack.c.bf16 %v899_v52, %v895_v51  ;;  %v878_v22 = vld [vmem:[#allocation8 + $0x450] sm:$0xff] }
 0x1ac   : > { %v1267_v61 = vpack.c.bf16 %v1027_v54, %v1023_v53  ;;  %v1010_v26 = vld [vmem:[#allocation8 + $0x870] sm:$0xff]  ;;  %v1194_v32 = vpack.c.bf16 %v882_v23, %v878_v22  ;;  %v983_v54 = vld [vmem:[#allocation8 + $0x798] sm:$0xff] }
 0x1ad   : > { %1454 = vmatpush2.bf16.msra.mxu1 %v1284_v0  ;;  %v887_v0 = vld [vmem:[#allocation8 + $0x498] sm:$0xff]  ;;  %v1258_v34 = vpack.c.bf16 %v1010_v26, %v1006_v24  ;;  %v1118_v51 = vld [vmem:[#allocation8 + $0xbd0] sm:$0xff] }
 0x1ae   : > { %1495 = vmatpush2.bf16.msra.mxu0 %v1158_v2  ;;  %1505 = vmatprep.subr.bf16.mxu1 %v1219_v3  ;;  %v1015_v2 = vld [vmem:[#allocation8 + $0x898] sm:$0xff]  ;;  %v1122_v53 = vld [vmem:[#allocation8 + $0xbf0] sm:$0xff] }
 0x1af   : > { %1546 = vmatprep.subr.bf16.mxu0 %v1283_v6  ;;  %v1019_v3 = vld [vmem:[#allocation8 + $0x8b8] sm:$0xff]  ;;  %v1199_v6 = vpack.c.bf16 %v891_v1, %v887_v0  ;;  %v1314_v59 = vpack.c.bf16 %v1122_v53, %v1118_v51  ;;  %v986_v63 = vld [vmem:[#allocation8 + $0x7b0] sm:$0xff] }
 0x1b0   : > { %1456 = vmatmul.mubr.bf16.vlgmr.msra.gmra.mxu1 %v2493_v17  ;;  %v1263_v10 = vpack.c.bf16 %v1019_v3, %v1015_v2  ;;  %v1110_v0 = vld [vmem:[#allocation8 + $0xb90] sm:$0xff]  ;;  %v975_v3 = vld [vmem:[#allocation8 + $0x758] sm:$0xff] }
 0x1b1   : > { %1497 = vmatmul.mubr.bf16.vlgmr.msra.gmra.mxu0 %v2478_v37  ;;  %1506 = vmatpush1.bf16.msra.mxu1 %v1218_v14  ;;  %v1035_v37 = vld [vmem:[#allocation8 + $0x938] sm:$0xff]  ;;  %v1018_v14 = vld [vmem:[#allocation8 + $0x8b0] sm:$0xff] }
 0x1b2   : > { %1537 = vmatprep.mubr.bf16.mxu1 %v2480_v38  ;;  %1547 = vmatpush1.bf16.msra.mxu0 %v1282_v12  ;;  %v1274_v38 = vpack.c.bf16 %v1042_v43, %v1038_v35  ;;  %v1271_v50 = vpack.c.bf16 %v1035_v37, %v1031_v40  ;;  %v1007_v12 = vld [vmem:[#allocation8 + $0x858] sm:$0xff]  ;;  %v1262_v20 = vpack.c.bf16 %v1018_v14, %v1014_v9  ;;  %v874_v43 = vld [vmem:[#allocation8 + $0x430] sm:$0xff] }
 0x1b3   : > { %1578 = vmatprep.mubr.bf16.mxu0 %v2488_v19  ;;  %1507 = vmatprep.subr.bf16.mxu1 %v1215_v21  ;;  %v1034_v19 = vld [vmem:[#allocation8 + $0x930] sm:$0xff]  ;;  %v1195_v21 = vpack.c.bf16 %v883_v16, %v879_v15  ;;  %v991_v37 = vld [vmem:[#allocation8 + $0x7d8] sm:$0xff] }
 0x1b4   : > { %1548 = vmatprep.subr.bf16.mxu0 %v1279_v25  ;;  %v1270_v56 = vpack.c.bf16 %v1034_v19, %v1030_v49  ;;  %v1259_v25 = vpack.c.bf16 %v1011_v62, %v1007_v12  ;;  %v1002_v40 = vld [vmem:[#allocation8 + $0x830] sm:$0xff]  ;;  %v967_v62 = vld [vmem:[#allocation8 + $0x718] sm:$0xff] }
 0x1b5   : > { %1508 = vmatpush1.bf16.msra.mxu1 %v1214_v28  ;;  %v875_v28 = vld [vmem:[#allocation8 + $0x438] sm:$0xff]  ;;  %v1254_v48 = vpack.c.bf16 %v1002_v40, %v998_v44  ;;  %v994_v19 = vld [vmem:[#allocation8 + $0x7f0] sm:$0xff] }
 0x1b6   : > { %1549 = vmatpush1.bf16.msra.mxu0 %v1278_v30  ;;  %1509 = vmatprep.subr.bf16.mxu1 %v1211_v31  ;;  %v999_v30 = vld [vmem:[#allocation8 + $0x818] sm:$0xff]  ;;  %v1191_v35 = vpack.c.bf16 %v875_v28, %v871_v27  ;;  %v1114_v2 = vld [vmem:[#allocation8 + $0xbb0] sm:$0xff] }
 0x1b7   : > { %1550 = vmatprep.subr.bf16.mxu0 %v1275_v36  ;;  %v1003_v31 = vld [vmem:[#allocation8 + $0x838] sm:$0xff]  ;;  %v870_v36 = vld [vmem:[#allocation8 + $0x410] sm:$0xff]  ;;  %v1310_v8 = vpack.c.bf16 %v1114_v2, %v1110_v0 }
 0x1b8   : > { %v1255_v39 = vpack.c.bf16 %v1003_v31, %v999_v30  ;;  %v1190_v47 = vpack.c.bf16 %v874_v43, %v870_v36  ;;  %v978_v14 = vld [vmem:[#allocation8 + $0x770] sm:$0xff]  ;;  %v959_v31 = vld [vmem:[#allocation8 + $0x6d8] sm:$0xff] }
 0x1b9   : > { %1510 = vmatpush1.bf16.msra.mxu1 %v1210_v41  ;;  %v995_v41 = vld [vmem:[#allocation8 + $0x7f8] sm:$0xff]  ;;  %v1102_v15 = vld [vmem:[#allocation8 + $0xb50] sm:$0xff] }
 0x1ba   : > { %1551 = vmatpush1.bf16.msra.mxu0 %v1274_v38  ;;  %1511 = vmatprep.subr.bf16.mxu1 %v1207_v42  ;;  %v1119_v38 = vld [vmem:[#allocation8 + $0xbd8] sm:$0xff]  ;;  %v1251_v49 = vpack.c.bf16 %v995_v41, %v991_v37  ;;  %v1106_v12 = vld [vmem:[#allocation8 + $0xb70] sm:$0xff] }
 0x1bb   : > { %1552 = vmatprep.subr.bf16.mxu0 %v1271_v50  ;;  %v1123_v42 = vld [vmem:[#allocation8 + $0xbf8] sm:$0xff]  ;;  %v990_v50 = vld [vmem:[#allocation8 + $0x7d0] sm:$0xff]  ;;  %v1306_v23 = vpack.c.bf16 %v1106_v12, %v1102_v15 }
 0x1bc   : > { %v1315_v52 = vpack.c.bf16 %v1123_v42, %v1119_v38  ;;  %v1250_v58 = vpack.c.bf16 %v994_v19, %v990_v50  ;;  %v970_v26 = vld [vmem:[#allocation8 + $0x730] sm:$0xff]  ;;  %v951_v42 = vld [vmem:[#allocation8 + $0x698] sm:$0xff] }
 0x1bd   : > { %1512 = vmatpush1.bf16.msra.mxu1 %v1206_v55  ;;  %v987_v55 = vld [vmem:[#allocation8 + $0x7b8] sm:$0xff]  ;;  %v1094_v27 = vld [vmem:[#allocation8 + $0xb10] sm:$0xff] }
 0x1be   : > { %1553 = vmatpush1.bf16.msra.mxu0 %v1270_v56  ;;  %1513 = vmatprep.subr.bf16.mxu1 %v1203_v57  ;;  %v1111_v56 = vld [vmem:[#allocation8 + $0xb98] sm:$0xff]  ;;  %v1247_v60 = vpack.c.bf16 %v987_v55, %v983_v54  ;;  %v1098_v30 = vld [vmem:[#allocation8 + $0xb30] sm:$0xff] }
 0x1bf   : > { %1554 = vmatprep.subr.bf16.mxu0 %v1267_v61  ;;  %v1115_v57 = vld [vmem:[#allocation8 + $0xbb8] sm:$0xff]  ;;  %v982_v61 = vld [vmem:[#allocation8 + $0x790] sm:$0xff]  ;;  %v1302_v43 = vpack.c.bf16 %v1098_v30, %v1094_v27 }
 0x1c0   : > { %v1311_v1 = vpack.c.bf16 %v1115_v57, %v1111_v56  ;;  %v1246_v7 = vpack.c.bf16 %v986_v63, %v982_v61  ;;  %v962_v40 = vld [vmem:[#allocation8 + $0x6f0] sm:$0xff]  ;;  %v943_v57 = vld [vmem:[#allocation8 + $0x658] sm:$0xff] }
 0x1c1   : > { %1514 = vmatpush1.bf16.msra.mxu1 %v1202_v4  ;;  %v979_v4 = vld [vmem:[#allocation8 + $0x778] sm:$0xff]  ;;  %v1086_v37 = vld [vmem:[#allocation8 + $0xad0] sm:$0xff] }
 0x1c2   : > { %1555 = vmatpush1.bf16.msra.mxu0 %v1266_v5  ;;  %1515 = vmatprep.subr.bf16.mxu1 %v1199_v6  ;;  %v1103_v5 = vld [vmem:[#allocation8 + $0xb58] sm:$0xff]  ;;  %v1243_v9 = vpack.c.bf16 %v979_v4, %v975_v3  ;;  %v1090_v38 = vld [vmem:[#allocation8 + $0xaf0] sm:$0xff] }
 0x1c3   : > { %1556 = vmatprep.subr.bf16.mxu0 %v1263_v10  ;;  %v1107_v6 = vld [vmem:[#allocation8 + $0xb78] sm:$0xff]  ;;  %v974_v10 = vld [vmem:[#allocation8 + $0x750] sm:$0xff]  ;;  %v1298_v19 = vpack.c.bf16 %v1090_v38, %v1086_v37  ;;  %v1763_v37 = vsel %vm1316_vm4, 1.0, %v2056_v13  ;;  %v1335_v13 = vsub.s32 3, %v2328_v29 }
 0x1c4   : > { %v1307_v16 = vpack.c.bf16 %v1107_v6, %v1103_v5  ;;  %v1242_v22 = vpack.c.bf16 %v978_v14, %v974_v10  ;;  %v954_v53 = vld [vmem:[#allocation8 + $0x6b0] sm:$0xff]  ;;  %v935_v6 = vld [vmem:[#allocation8 + $0x618] sm:$0xff] }
 0x1c5   : > { %1516 = vmatpush1.bf16.msra.mxu1 %v1198_v18  ;;  %v971_v18 = vld [vmem:[#allocation8 + $0x738] sm:$0xff]  ;;  %v1078_v54 = vld [vmem:[#allocation8 + $0xa90] sm:$0xff] }
 0x1c6   : > { %1557 = vmatpush1.bf16.msra.mxu0 %v1262_v20  ;;  %1517 = vmatprep.subr.bf16.mxu1 %v1195_v21  ;;  %v1095_v20 = vld [vmem:[#allocation8 + $0xb18] sm:$0xff]  ;;  %v1239_v24 = vpack.c.bf16 %v971_v18, %v967_v62  ;;  %v1082_v56 = vld [vmem:[#allocation8 + $0xab0] sm:$0xff] }
 0x1c7   : > { %1558 = vmatprep.subr.bf16.mxu0 %v1259_v25  ;;  %v1099_v21 = vld [vmem:[#allocation8 + $0xb38] sm:$0xff]  ;;  %v966_v25 = vld [vmem:[#allocation8 + $0x710] sm:$0xff]  ;;  %v1294_v63 = vpack.c.bf16 %v1082_v56, %v1078_v54 }
 0x1c8   : > { %v1303_v28 = vpack.c.bf16 %v1099_v21, %v1095_v20  ;;  %v1238_v36 = vpack.c.bf16 %v970_v26, %v966_v25  ;;  %v946_v2 = vld [vmem:[#allocation8 + $0x670] sm:$0xff] }
 0x1c9   : > { %1518 = vmatpush1.bf16.msra.mxu1 %v1194_v32  ;;  %v963_v32 = vld [vmem:[#allocation8 + $0x6f8] sm:$0xff]  ;;  %v1070_v3 = vld [vmem:[#allocation8 + $0xa50] sm:$0xff] }
 0x1ca   : > { %1559 = vmatpush1.bf16.msra.mxu0 %v1258_v34  ;;  %1519 = vmatprep.subr.bf16.mxu1 %v1191_v35  ;;  %v1087_v34 = vld [vmem:[#allocation8 + $0xad8] sm:$0xff]  ;;  %v1235_v44 = vpack.c.bf16 %v963_v32, %v959_v31  ;;  %v1074_v5 = vld [vmem:[#allocation8 + $0xa70] sm:$0xff]  ;;  %v1319_v32 = vld [vmem:[#allocation10] sm:$0xf] }
 0x1cb   : > { %1560 = vmatprep.subr.bf16.mxu0 %v1255_v39  ;;  %v1091_v35 = vld [vmem:[#allocation8 + $0xaf8] sm:$0xff]  ;;  %v958_v39 = vld [vmem:[#allocation8 + $0x6d0] sm:$0xff]  ;;  %v1290_v14 = vpack.c.bf16 %v1074_v5, %v1070_v3 }
 0x1cc   : > { %v1299_v41 = vpack.c.bf16 %v1091_v35, %v1087_v34  ;;  %v1234_v50 = vpack.c.bf16 %v962_v40, %v958_v39  ;;  %v938_v12 = vld [vmem:[#allocation8 + $0x630] sm:$0xff]  ;;  %v1324_v34 = vrot.slane %v1319_v32, %v2345_v46  ;;  %v1328_v35 = vrot.slane %v1319_v32, %v2342_v45 }
 0x1cd   : > { %1520 = vmatpush1.bf16.msra.mxu1 %v1190_v47  ;;  %v955_v47 = vld [vmem:[#allocation8 + $0x6b8] sm:$0xff]  ;;  %v1062_v18 = vld [vmem:[#allocation8 + $0xa10] sm:$0xff] }
 0x1ce   : > { %1561 = vmatpush1.bf16.msra.mxu0 %v1254_v48  ;;  %1521 = vmatprep.subr.bf16.mxu1 %v1251_v49  ;;  %v1079_v48 = vld [vmem:[#allocation8 + $0xa98] sm:$0xff]  ;;  %v1231_v51 = vpack.c.bf16 %v955_v47, %v951_v42  ;;  %v1066_v20 = vld [vmem:[#allocation8 + $0xa30] sm:$0xff] }
 0x1cf   : > { %1562 = vmatprep.subr.bf16.mxu0 %v1315_v52  ;;  %v1083_v49 = vld [vmem:[#allocation8 + $0xab8] sm:$0xff]  ;;  %v950_v52 = vld [vmem:[#allocation8 + $0x690] sm:$0xff] }
 0x1d0   : > { %v1295_v55 = vpack.c.bf16 %v1083_v49, %v1079_v48  ;;  %v1230_v61 = vpack.c.bf16 %v954_v53, %v950_v52 }
 0x1d1   : > { %1522 = vmatpush2.bf16.msra.mxu1 %v1250_v58  ;;  %v947_v58 = vld [vmem:[#allocation8 + $0x678] sm:$0xff] }
 0x1d2   : > { %1563 = vmatpush2.bf16.msra.mxu0 %v1314_v59  ;;  %1523 = vmatprep.subr.bf16.mxu1 %v1247_v60  ;;  %v1071_v59 = vld [vmem:[#allocation8 + $0xa58] sm:$0xff]  ;;  %v1227_v0 = vpack.c.bf16 %v947_v58, %v943_v57 }
 0x1d3   : > { %1564 = vmatprep.subr.bf16.mxu0 %v1311_v1  ;;  %v1075_v60 = vld [vmem:[#allocation8 + $0xa78] sm:$0xff]  ;;  %v942_v1 = vld [vmem:[#allocation8 + $0x650] sm:$0xff] }
 0x1d4   : > { %v1291_v4 = vpack.c.bf16 %v1075_v60, %v1071_v59  ;;  %v1226_v10 = vpack.c.bf16 %v946_v2, %v942_v1 }
 0x1d5   : > { %1524 = vmatpush2.bf16.msra.mxu1 %v1246_v7  ;;  %v939_v7 = vld [vmem:[#allocation8 + $0x638] sm:$0xff] }
 0x1d6   : > { %1565 = vmatpush2.bf16.msra.mxu0 %v1310_v8  ;;  %1525 = vmatprep.subr.bf16.mxu1 %v1243_v9  ;;  %v1063_v8 = vld [vmem:[#allocation8 + $0xa18] sm:$0xff]  ;;  %v1223_v15 = vpack.c.bf16 %v939_v7, %v935_v6 }
 0x1d7   : > { %1566 = vmatprep.subr.bf16.mxu0 %v1307_v16  ;;  %v1067_v9 = vld [vmem:[#allocation8 + $0xa38] sm:$0xff]  ;;  %v934_v16 = vld [vmem:[#allocation8 + $0x610] sm:$0xff] }
 0x1d8   : > { %v1287_v62 = vpack.c.bf16 %v1067_v9, %v1063_v8  ;;  %v1222_v21 = vpack.c.bf16 %v938_v12, %v934_v16 }
 0x1d9   : > { %1526 = vmatpush2.bf16.msra.mxu1 %v1242_v22  ;;  %v1286_v22 = vpack.c.bf16 %v1066_v20, %v1062_v18 }
 0x1da   : > { %1567 = vmatpush2.bf16.msra.mxu0 %v1306_v23  ;;  %1527 = vmatprep.subr.bf16.mxu1 %v1239_v24 }
 0x1db   : > { %1568 = vmatprep.subr.bf16.mxu0 %v1303_v28 }
 0x1dd   : > { %1528 = vmatpush2.bf16.msra.mxu1 %v1238_v36 }
 0x1de   : > { %1569 = vmatpush2.bf16.msra.mxu0 %v1302_v43  ;;  %1529 = vmatprep.subr.bf16.mxu1 %v1235_v44 }
 0x1df   : > { %1570 = vmatprep.subr.bf16.mxu0 %v1299_v41 }
 0x1e1   : > { %1530 = vmatpush2.bf16.msra.mxu1 %v1234_v50  ;;  %v1331_v50 = vsub.s32 2, %v2328_v29 }
 0x1e2   : > { %1571 = vmatpush2.bf16.msra.mxu0 %v1298_v19  ;;  %1531 = vmatprep.subr.bf16.mxu1 %v1231_v51  ;;  %v1336_v51 = vrot.slane %v1319_v32, %v1335_v13 }
 0x1e3   : > { %1572 = vmatprep.subr.bf16.mxu0 %v1295_v55  ;;  %v1332_v19 = vrot.slane %v1319_v32, %v1331_v50 }
 0x1e5   : > { %1532 = vmatpush2.bf16.msra.mxu1 %v1230_v61 }
 0x1e6   : > { %1573 = vmatpush2.bf16.msra.mxu0 %v1294_v63  ;;  %1533 = vmatprep.subr.bf16.mxu1 %v1227_v0 }
 0x1e7   : > { %1574 = vmatprep.subr.bf16.mxu0 %v1291_v4 }
 0x1e9   : > { %1534 = vmatpush2.bf16.msra.mxu1 %v1226_v10 }
 0x1ea   : > { %1575 = vmatpush2.bf16.msra.mxu0 %v1290_v14  ;;  %1535 = vmatprep.subr.bf16.mxu1 %v1223_v15 }
 0x1eb   : > { %1576 = vmatprep.subr.bf16.mxu0 %v1287_v62 }
 0x1ed   : > { %1536 = vmatpush2.bf16.msra.mxu1 %v1222_v21 }
 0x1ee   : > { %1577 = vmatpush2.bf16.msra.mxu0 %v1286_v22 }
 0x1f0   : > { %1538 = vmatmul.mubr.bf16.vlgmr.msra.gmra.mxu1 %v2476_v33 }
 0x1f1   : > { %1579 = vmatmul.mubr.bf16.vlgmr.msra.gmra.mxu0 %v2493_v17 }
 0x230   : > { %v1375_v23 = vpop.f32.mrf.mxu1 }
 0x231   : > { %v1416_v24 = vpop.f32.mrf.mxu0  ;;  %v1376_v36 = vadd.f32 %v1375_v23, %v1324_v34 }
 0x232   : > { %v1377_v25 = vpop.f32.mrf.mxu1 }
 0x233   : > { %v1418_v26 = vpop.f32.mrf.mxu0  ;;  %v1378_v43 = vadd.f32 %v1377_v25, %v1328_v35  ;;  %v1417_v33 = vadd.f32 %v1416_v24, %v1376_v36 }
 0x234   : > { %v1379_v27 = vpop.f32.mrf.mxu1 }
 0x235   : > { %v1420_v28 = vpop.f32.mrf.mxu0  ;;  %v1419_v44 = vadd.f32 %v1418_v26, %v1378_v43 }
 0x236   : > { %v1380_v30 = vpop.f32.mrf.mxu1 }
 0x237   : > { %v1421_v31 = vpop.f32.mrf.mxu0 }
 0x270   : > { %v1457_v17 = vpop.f32.mrf.mxu1 }
 0x271   : > { %v1458_v39 = vadd.f32 %v1457_v17, %v1417_v33  ;;  %v1498_v40 = vpop.f32.mrf.mxu0 }
 0x272   : > { %v1459_v41 = vpop.f32.mrf.mxu1  ;;  %v1499_v52 = vadd.f32 %v1498_v40, %v1332_v19 }
 0x273   : > { %v1587_v38 = vmul.f32 %v1763_v37, %v1458_v39  ;;  %v1460_v42 = vadd.f32 %v1459_v41, %v1419_v44  ;;  %v1500_v47 = vpop.f32.mrf.mxu0 }
 0x274   : > { %v1461_v48 = vpop.f32.mrf.mxu1  ;;  %v1501_v54 = vadd.f32 %v1500_v47, %v1336_v51 }
 0x275   : > { %1591 = vst [vmem:[%s2506_s16] sm:$0xff] %v1587_v38  ;;  %v1588_v45 = vmul.f32 %v1763_v37, %v1460_v42  ;;  %v1502_v46 = vpop.f32.mrf.mxu0 }
 0x276   : > { %v1462_v11 = vpop.f32.mrf.mxu1 }
 0x277   : > { %1592 = vst [vmem:[%s2506_s16 + $0x8] sm:$0xff] %v1588_v45  ;;  %v1503_v49 = vpop.f32.mrf.mxu0 }
 0x2b0   : > { %v1539_v53 = vpop.f32.mrf.mxu1 }
 0x2b1   : > { %v1540_v55 = vadd.f32 %v1539_v53, %v1499_v52  ;;  %v1580_v56 = vpop.f32.mrf.mxu0 }
 0x2b2   : > { %v1541_v57 = vpop.f32.mrf.mxu1 }
 0x2b3   : > { %v1581_v58 = vadd.f32 %v1580_v56, %v1540_v55  ;;  %v1542_v59 = vadd.f32 %v1541_v57, %v1501_v54  ;;  %v1582_v60 = vpop.f32.mrf.mxu0 }
 0x2b4   : > { %v1543_v61 = vpop.f32.mrf.mxu1 }
 0x2b5   : > { %v1589_v63 = vmul.f32 %v1763_v37, %v1581_v58  ;;  %v1583_v29 = vadd.f32 %v1582_v60, %v1542_v59  ;;  %v1584_v0 = vpop.f32.mrf.mxu0 }
 0x2b6   : > { %v1544_v1 = vpop.f32.mrf.mxu1 }
 0x2b7   : > { %1593 = vst [vmem:[%s2506_s16 + $0x10] sm:$0xff] %v1589_v63  ;;  %v1590_v2 = vmul.f32 %v1763_v37, %v1583_v29  ;;  %v1585_v3 = vpop.f32.mrf.mxu0 }
 0x2b9   : > { %1594 = vst [vmem:[%s2506_s16 + $0x18] sm:$0xff] %v1590_v2 }
 0x2ba   : > { %1983 = shalt.err (!%p1980_p2)
}
 0x2bb   : > { %s1984_s8 = scalar_lea.hbm %s1608_s13, 512  ;;  %s1988_s0 = scalar_lea.hbm %s2555_s5, 1024 }
 0x2bc   : > { %p1985_p0 = scmp.ne.s32.totalorder %s1608_s13, %s1984_s8  ;;  %p1989_p5 = scmp.lt.s32.totalorder %s1608_s13, %s2555_s5 }
 0x2bd   : > { %p1990_p13 = scmp.lt.s32.totalorder %s1988_s0, %s1984_s8 }
 0x2be   : > { %p1986_p7 = pnand %p1985_p0, %p2581_p4 }
 0x2bf   : > { %p1991_p12 = por %p1990_p13, %p1989_p5 }
 0x2c0   : > { %p1987_p9 = pneg %p1986_p7 }
 0x2c2   : > { %p1992_p8 = pnand %p1991_p12, %p1987_p9 }
 0x2c4   : > { %1995 = shalt.err (!%p1992_p8)
}
 0x2c5   : > { %1797 = dma.vmem_to_hbm [thread:$0]  (%p2581_p4), %s1611_s23, 512, %s1608_s13, %s1596_s11  }
 0x2c6 PF: > { %s1622_s29 = sand.u32 1, %s2030_s18   ;;  %p2582_p10 = scmp.ne.s32.totalorder %s2565_s6, 0 }
 0x2c7   : > { %p2583_p1 = scmp.ge.s32.totalorder %s2042_s21, 2  ;;  %s1623_s16 = scalar_lea.sflag [#allocation4], %s1622_s29 }
 0x2c9   : > { %p1810_p6 = pnand %p2583_p1, %p2582_p10 }
 0x2cb   : > { %p1811_p11 = pneg %p1810_p6 }
 0x2cd   : > { %2025 = dma.done.wait (%p1811_p11), %s1623_s16, 512  }
 0x2ce   : > { %2027 = vsyncadd (%p1811_p11), %s1623_s16, 4294966784  ;;  %p20_p3 = scmp.ge.s32.totalorder %s2113_s24, 4   ;;  %s2584_s18 = smov %s2034_s19 }
 0x2cf   : > { %s2585_s19 = smov %s2038_s20  ;;  %s2586_s20 = smov %s2125_s27 }
 0x2d0   : > { %s2587_s21 = smov %s2113_s24  ;;  %22 = sbr.rel (!%p20_p3) target bundleno = 9 (0x9), region = 114 }
 0x2d5   :  { %1628 = vsyncpa [#allocation3], 1 }
 0x2d6   :  { %1630 = vsyncpa [#allocation3 + $0x1], 1 }
 0x2d7   :  { %1631 = vsyncpa [#allocation6], 1 }
 0x2d8   :  { %1633 = vsyncpa [#allocation6 + $0x1], 1 }
 0x2d9   :  { %1634 = vsyncpa [#allocation9], 1 }
 0x2da   :  { %1635 = vsyncpa [#allocation4], 1 }
 0x2db   :  { %1637 = vsyncpa [#allocation4 + $0x1], 1 }

</bundles_post_ra>
